<compile_context>
chip_gen: v7x
topology: tpu7x:2x2x1
jax: 0.10.0
libtpu: 0.0.40
codegen_flags: <defaults>
</compile_context>

<pallas_src>
import jax
import jax.numpy as jnp
from jax.experimental import pallas as pl
from jax.experimental.pallas import tpu as pltpu

N_BITS = 8
N_LEVELS = 2 ** N_BITS
# forward search range for weights (is_act=False), matches the PyTorch module
SEARCH_RANGE = (0.97, 0.98, 0.99, 0.995, 0.9995, 0.9997, 0.9999, 0.99995, 0.99999)
N_CAND = len(SEARCH_RANGE)


def _fused_kernel(maxs_ref, mins_ref, x_ref, o_ref, params_ref, ssum_ref):
    """Fused score -> argmin -> quant kernel.

    grid = (2, n_blocks): axis 0 is the pass (0 = score, 1 = quant), axis 1 is row tiles.

    maxs_ref, mins_ref : (K,) f32 SMEM inputs (candidate clip max / min)
    x_ref              : (TR, 128) f32 VMEM input tile
    o_ref              : (TR, 128) f32 VMEM output tile (only written in pass 1)
    params_ref         : (2,)  f32 SMEM output: [delta, zero_point]
    ssum_ref           : (K,)  f32 SMEM scratch: per-candidate squared-error sums
    """
    p = pl.program_id(0)
    i = pl.program_id(1)
    n_blocks = pl.num_programs(1)
    qmax = float(N_LEVELS - 1)

    # ---------------- pass 0: score all candidates on this tile ----------------
    @pl.when(p == 0)
    def _score_pass():
        @pl.when(i == 0)
        def _init():
            for k in range(N_CAND):
                ssum_ref[k] = jnp.float32(0.0)

        x = x_ref[...]
        for k in range(N_CAND):  # static unroll, K = 9
            new_max = maxs_ref[k]
            new_min = mins_ref[k]
            delta = (new_max - new_min) / (N_LEVELS - 1)          # scalar
            inv_delta = 1.0 / delta                               # scalar reciprocal (once)
            zero_point = jnp.round(-new_min / delta)              # scalar, matches torch
            x_int = jnp.round(x * inv_delta)                      # VALU mul, not vector div
            x_quant = jnp.clip(x_int + zero_point, 0.0, qmax)
            x_float_q = (x_quant - zero_point) * delta
            diff = x - x_float_q
            # un-normalized sum; /n_elems hoisted out (argmin is scale-invariant)
            ssum_ref[k] = ssum_ref[k] + jnp.sum(diff * diff)

        # last tile of the score pass: argmin + final delta / zero_point
        @pl.when(i == n_blocks - 1)
        def _finalize():
            # torch loop uses strict '<' with best_score init 1e10 -> first minimum wins
            best_score = ssum_ref[0]
            best_max = maxs_ref[0]
            best_min = mins_ref[0]
            for k in range(1, N_CAND):
                sc = ssum_ref[k]
                better = sc < best_score
                best_score = jnp.where(better, sc, best_score)
                best_max = jnp.where(better, maxs_ref[k], best_max)
                best_min = jnp.where(better, mins_ref[k], best_min)
            delta_best = (best_max - best_min) / (2 ** N_BITS - 1)
            zp_best = jnp.round(-best_min / delta_best)
            params_ref[0] = delta_best
            params_ref[1] = zp_best

    # ---------------- pass 1: quant/dequant with the winning params ----------------
    @pl.when(p == 1)
    def _quant_pass():
        delta = params_ref[0]
        zero_point = params_ref[1]
        inv_delta = 1.0 / delta                                   # scalar reciprocal
        x = x_ref[...]
        x_int = jnp.round(x * inv_delta) + zero_point             # round_ste forward value
        x_quant = jnp.clip(x_int, 0.0, qmax)
        o_ref[...] = (x_quant - zero_point) * delta


def _pick_tile_rows(rows, max_rows=1024):
    """Largest row-tile <= max_rows that divides `rows` (rows is a multiple of 8)."""
    if rows <= max_rows:
        return rows
    for tr in range(max_rows, 7, -8):
        if rows % tr == 0:
            return tr
    return 8


def uniform_quantizer_forward(x):
    """Emulates UniformQuantizer(n_bits=8, channel_wise=False, is_act=False).forward(x)
    on first call (inited == 0): init scale via percentile search, then quant/dequant."""
    orig_shape = x.shape
    x = x.astype(jnp.float32)
    flat = x.reshape(-1)
    total = flat.shape[0]
    assert total % 128 == 0 and (total // 128) % 8 == 0, "expects 1024-multiple sizes"
    rows = total // 128
    x2d = flat.reshape(rows, 128)

    # --- candidate clip ranges via percentiles (plain-JAX glue; sort-based) ---
    # TODO(synk): torch.quantile has no Pallas equivalent; computed with jnp.quantile here.
    pcts = jnp.asarray(SEARCH_RANGE, dtype=jnp.float32)
    maxs = jnp.quantile(flat, pcts).astype(jnp.float32)
    mins = jnp.quantile(flat, 1.0 - pcts).astype(jnp.float32)

    TR = _pick_tile_rows(rows)
    n_blocks = rows // TR

    out2d, params = pl.pallas_call(
        _fused_kernel,
        out_shape=(
            jax.ShapeDtypeStruct((rows, 128), jnp.float32),
            jax.ShapeDtypeStruct((2,), jnp.float32),
        ),
        grid=(2, n_blocks),
        in_specs=[
            pl.BlockSpec(memory_space=pltpu.MemorySpace.SMEM),   # candidate maxs
            pl.BlockSpec(memory_space=pltpu.MemorySpace.SMEM),   # candidate mins
            pl.BlockSpec((TR, 128), lambda p, i: (i, 0)),        # x tile (read in both passes)
        ],
        out_specs=(
            # pass 0 parks on block 0 (never written there); pass 1 writes block i.
            pl.BlockSpec((TR, 128), lambda p, i: (i * p, 0)),
            pl.BlockSpec(memory_space=pltpu.MemorySpace.SMEM),   # [delta, zero_point]
        ),
        scratch_shapes=[pltpu.SMEM((N_CAND,), jnp.float32)],
        compiler_params=pltpu.CompilerParams(
            # both axes carry state (SMEM accumulator / params) -> sequential
            dimension_semantics=("arbitrary", "arbitrary")),
    )(maxs, mins, x2d)

    delta = params[0]
    zero_point = params[1]
    return out2d.reshape(orig_shape), delta, zero_point


def _reference_forward(x):
    """Pure-JAX reference mirroring the PyTorch module, for a correctness check."""
    flat = x.reshape(-1).astype(jnp.float32)
    pcts = jnp.asarray(SEARCH_RANGE, dtype=jnp.float32)
    maxs = jnp.quantile(flat, pcts)
    mins = jnp.quantile(flat, 1.0 - pcts)

    def score(mx, mn):
        d = (mx - mn) / (N_LEVELS - 1)
        zp = jnp.round(-mn / d)
        xq = (jnp.clip(jnp.round(flat / d) + zp, 0, N_LEVELS - 1) - zp) * d
        return jnp.mean((flat - xq) ** 2)

    scores = jax.vmap(score)(maxs, mins)
    b = jnp.argmin(scores)
    delta = (maxs[b] - mins[b]) / (2 ** N_BITS - 1)
    zp = jnp.round(-mins[b] / delta)
    xq = jnp.clip(jnp.round(x / delta) + zp, 0, N_LEVELS - 1)
    return (xq - zp) * delta, delta, zp


if __name__ == "__main__":
    key = jax.random.PRNGKey(0)
    # NCHW conv-style weight/activation tensor
    x = jax.random.normal(key, (2, 4, 16, 16), dtype=jnp.float32)

    out, delta, zero_point = uniform_quantizer_forward(x)
    out = jax.block_until_ready(out)

    ref, ref_delta, ref_zp = _reference_forward(x)
    assert out.shape == x.shape and out.dtype == jnp.float32
    assert jnp.allclose(delta, ref_delta, rtol=1e-6, atol=0.0), "delta mismatch"
    assert jnp.allclose(zero_point, ref_zp), "zero_point mismatch"
    # x*(1/delta) vs x/delta may flip rounding at exact .5 boundaries -> allow <= 1 level
    # on a tiny fraction of elements; everything else must match exactly.
    abs_err = jnp.abs(out - ref)
    assert float(jnp.max(abs_err)) <= float(ref_delta) * 1.0001 + 1e-6, "quant level mismatch"
    assert float(jnp.mean((abs_err > 1e-5).astype(jnp.float32))) < 0.01, "too many mismatches"

    print("KERNEL_OK")
</pallas_src>

<mosaic_0001>
module attributes {stable_mosaic.version = 11 : i64} {
  func.func @_fused_kernel(%arg0: i32, %arg1: i32, %arg2: memref<9xf32, #tpu.memory_space<smem>>, %arg3: memref<9xf32, #tpu.memory_space<smem>>, %arg4: memref<16x128xf32, #tpu.memory_space<vmem>>, %arg5: memref<16x128xf32, #tpu.memory_space<vmem>>, %arg6: memref<2xf32, #tpu.memory_space<smem>>, %arg7: memref<9xf32, #tpu.memory_space<smem>>) attributes {dimension_semantics = [#tpu.dimension_semantics<arbitrary>, #tpu.dimension_semantics<arbitrary>], iteration_bounds = array<i64: 2, 1>, scalar_prefetch = 0 : i64, scratch_operands = 1 : i64, tpu.core_type = #tpu.core_type<tc>, window_params = [{transform_indices = @transform_0, window_bounds = array<i64: 9>}, {transform_indices = @transform_1, window_bounds = array<i64: 9>}, {transform_indices = @transform_2, window_bounds = array<i64: 16, 128>}, {transform_indices = @transform_3, window_bounds = array<i64: 16, 128>}, {transform_indices = @transform_4, window_bounds = array<i64: 2>}]} {
    %c0_i32 = arith.constant 0 : i32
    %0 = arith.cmpi eq, %arg0, %c0_i32 : i32
    %1 = arith.extui %0 : i1 to i32
    %c0_i32_0 = arith.constant 0 : i32
    %2 = arith.cmpi ne, %1, %c0_i32_0 : i32
    scf.if %2 {
      %c0_i32_2 = arith.constant 0 : i32
      %6 = arith.cmpi eq, %arg1, %c0_i32_2 : i32
      %7 = arith.extui %6 : i1 to i32
      %c0_i32_3 = arith.constant 0 : i32
      %8 = arith.cmpi ne, %7, %c0_i32_3 : i32
      scf.if %8 {
        %cst_88 = arith.constant 0.000000e+00 : f32
        %c0_89 = arith.constant 0 : index
        %283 = memref.load %arg7[%c0_89] : memref<9xf32, #tpu.memory_space<smem>>
        memref.store %cst_88, %arg7[%c0_89] : memref<9xf32, #tpu.memory_space<smem>>
        %cst_90 = arith.constant 0.000000e+00 : f32
        %c1_91 = arith.constant 1 : index
        %284 = memref.load %arg7[%c1_91] : memref<9xf32, #tpu.memory_space<smem>>
        memref.store %cst_90, %arg7[%c1_91] : memref<9xf32, #tpu.memory_space<smem>>
        %cst_92 = arith.constant 0.000000e+00 : f32
        %c2_93 = arith.constant 2 : index
        %285 = memref.load %arg7[%c2_93] : memref<9xf32, #tpu.memory_space<smem>>
        memref.store %cst_92, %arg7[%c2_93] : memref<9xf32, #tpu.memory_space<smem>>
        %cst_94 = arith.constant 0.000000e+00 : f32
        %c3_95 = arith.constant 3 : index
        %286 = memref.load %arg7[%c3_95] : memref<9xf32, #tpu.memory_space<smem>>
        memref.store %cst_94, %arg7[%c3_95] : memref<9xf32, #tpu.memory_space<smem>>
        %cst_96 = arith.constant 0.000000e+00 : f32
        %c4_97 = arith.constant 4 : index
        %287 = memref.load %arg7[%c4_97] : memref<9xf32, #tpu.memory_space<smem>>
        memref.store %cst_96, %arg7[%c4_97] : memref<9xf32, #tpu.memory_space<smem>>
        %cst_98 = arith.constant 0.000000e+00 : f32
        %c5_99 = arith.constant 5 : index
        %288 = memref.load %arg7[%c5_99] : memref<9xf32, #tpu.memory_space<smem>>
        memref.store %cst_98, %arg7[%c5_99] : memref<9xf32, #tpu.memory_space<smem>>
        %cst_100 = arith.constant 0.000000e+00 : f32
        %c6_101 = arith.constant 6 : index
        %289 = memref.load %arg7[%c6_101] : memref<9xf32, #tpu.memory_space<smem>>
        memref.store %cst_100, %arg7[%c6_101] : memref<9xf32, #tpu.memory_space<smem>>
        %cst_102 = arith.constant 0.000000e+00 : f32
        %c7_103 = arith.constant 7 : index
        %290 = memref.load %arg7[%c7_103] : memref<9xf32, #tpu.memory_space<smem>>
        memref.store %cst_102, %arg7[%c7_103] : memref<9xf32, #tpu.memory_space<smem>>
        %cst_104 = arith.constant 0.000000e+00 : f32
        %c8_105 = arith.constant 8 : index
        %291 = memref.load %arg7[%c8_105] : memref<9xf32, #tpu.memory_space<smem>>
        memref.store %cst_104, %arg7[%c8_105] : memref<9xf32, #tpu.memory_space<smem>>
      } else {
      }
      %c0 = arith.constant 0 : index
      %c0_4 = arith.constant 0 : index
      %9 = vector.load %arg4[%c0, %c0_4] : memref<16x128xf32, #tpu.memory_space<vmem>>, vector<16x128xf32>
      %c0_5 = arith.constant 0 : index
      %10 = memref.load %arg2[%c0_5] : memref<9xf32, #tpu.memory_space<smem>>
      %c0_6 = arith.constant 0 : index
      %11 = memref.load %arg3[%c0_6] : memref<9xf32, #tpu.memory_space<smem>>
      %12 = arith.subf %10, %11 : f32
      %cst = arith.constant 2.550000e+02 : f32
      %13 = arith.divf %12, %cst : f32
      %cst_7 = arith.constant 1.000000e+00 : f32
      %14 = arith.divf %cst_7, %13 : f32
      %cst_8 = arith.constant 0.000000e+00 : f32
      %15 = arith.subf %cst_8, %11 : f32
      %16 = arith.divf %15, %13 : f32
      %17 = math.roundeven %16 : f32
      %18 = vector.broadcast %14 : f32 to vector<16x128xf32>
      %19 = arith.mulf %9, %18 : vector<16x128xf32>
      %20 = math.roundeven %19 : vector<16x128xf32>
      %21 = vector.broadcast %17 : f32 to vector<16x128xf32>
      %22 = arith.addf %20, %21 : vector<16x128xf32>
      %cst_9 = arith.constant 0.000000e+00 : f32
      %cst_10 = arith.constant 2.550000e+02 : f32
      %23 = vector.broadcast %cst_9 : f32 to vector<16x128xf32>
      %24 = arith.maximumf %23, %22 : vector<16x128xf32>
      %25 = vector.broadcast %cst_10 : f32 to vector<16x128xf32>
      %26 = arith.minimumf %25, %24 : vector<16x128xf32>
      %27 = vector.broadcast %17 : f32 to vector<16x128xf32>
      %28 = arith.subf %26, %27 : vector<16x128xf32>
      %29 = vector.broadcast %13 : f32 to vector<16x128xf32>
      %30 = arith.mulf %28, %29 : vector<16x128xf32>
      %31 = arith.subf %9, %30 : vector<16x128xf32>
      %c0_11 = arith.constant 0 : index
      %32 = memref.load %arg7[%c0_11] : memref<9xf32, #tpu.memory_space<smem>>
      %33 = arith.mulf %31, %31 : vector<16x128xf32>
      %34 = vector.shape_cast %33 : vector<16x128xf32> to vector<1x16x128xf32>
      %cst_12 = arith.constant dense<0.000000e+00> : vector<1xf32>
      %35 = vector.multi_reduction <add>, %34, %cst_12 [1, 2] : vector<1x16x128xf32> to vector<1xf32>
      %36 = vector.shape_cast %35 : vector<1xf32> to vector<1x1x1xf32>
      %37 = vector.extract %36[0, 0, 0] : f32 from vector<1x1x1xf32>
      %38 = arith.addf %32, %37 : f32
      %c0_13 = arith.constant 0 : index
      %39 = memref.load %arg7[%c0_13] : memref<9xf32, #tpu.memory_space<smem>>
      memref.store %38, %arg7[%c0_13] : memref<9xf32, #tpu.memory_space<smem>>
      %c1 = arith.constant 1 : index
      %40 = memref.load %arg2[%c1] : memref<9xf32, #tpu.memory_space<smem>>
      %c1_14 = arith.constant 1 : index
      %41 = memref.load %arg3[%c1_14] : memref<9xf32, #tpu.memory_space<smem>>
      %42 = arith.subf %40, %41 : f32
      %cst_15 = arith.constant 2.550000e+02 : f32
      %43 = arith.divf %42, %cst_15 : f32
      %cst_16 = arith.constant 1.000000e+00 : f32
      %44 = arith.divf %cst_16, %43 : f32
      %cst_17 = arith.constant 0.000000e+00 : f32
      %45 = arith.subf %cst_17, %41 : f32
      %46 = arith.divf %45, %43 : f32
      %47 = math.roundeven %46 : f32
      %48 = vector.broadcast %44 : f32 to vector<16x128xf32>
      %49 = arith.mulf %9, %48 : vector<16x128xf32>
      %50 = math.roundeven %49 : vector<16x128xf32>
      %51 = vector.broadcast %47 : f32 to vector<16x128xf32>
      %52 = arith.addf %50, %51 : vector<16x128xf32>
      %cst_18 = arith.constant 0.000000e+00 : f32
      %cst_19 = arith.constant 2.550000e+02 : f32
      %53 = vector.broadcast %cst_18 : f32 to vector<16x128xf32>
      %54 = arith.maximumf %53, %52 : vector<16x128xf32>
      %55 = vector.broadcast %cst_19 : f32 to vector<16x128xf32>
      %56 = arith.minimumf %55, %54 : vector<16x128xf32>
      %57 = vector.broadcast %47 : f32 to vector<16x128xf32>
      %58 = arith.subf %56, %57 : vector<16x128xf32>
      %59 = vector.broadcast %43 : f32 to vector<16x128xf32>
      %60 = arith.mulf %58, %59 : vector<16x128xf32>
      %61 = arith.subf %9, %60 : vector<16x128xf32>
      %c1_20 = arith.constant 1 : index
      %62 = memref.load %arg7[%c1_20] : memref<9xf32, #tpu.memory_space<smem>>
      %63 = arith.mulf %61, %61 : vector<16x128xf32>
      %64 = vector.shape_cast %63 : vector<16x128xf32> to vector<1x16x128xf32>
      %cst_21 = arith.constant dense<0.000000e+00> : vector<1xf32>
      %65 = vector.multi_reduction <add>, %64, %cst_21 [1, 2] : vector<1x16x128xf32> to vector<1xf32>
      %66 = vector.shape_cast %65 : vector<1xf32> to vector<1x1x1xf32>
      %67 = vector.extract %66[0, 0, 0] : f32 from vector<1x1x1xf32>
      %68 = arith.addf %62, %67 : f32
      %c1_22 = arith.constant 1 : index
      %69 = memref.load %arg7[%c1_22] : memref<9xf32, #tpu.memory_space<smem>>
      memref.store %68, %arg7[%c1_22] : memref<9xf32, #tpu.memory_space<smem>>
      %c2 = arith.constant 2 : index
      %70 = memref.load %arg2[%c2] : memref<9xf32, #tpu.memory_space<smem>>
      %c2_23 = arith.constant 2 : index
      %71 = memref.load %arg3[%c2_23] : memref<9xf32, #tpu.memory_space<smem>>
      %72 = arith.subf %70, %71 : f32
      %cst_24 = arith.constant 2.550000e+02 : f32
      %73 = arith.divf %72, %cst_24 : f32
      %cst_25 = arith.constant 1.000000e+00 : f32
      %74 = arith.divf %cst_25, %73 : f32
      %cst_26 = arith.constant 0.000000e+00 : f32
      %75 = arith.subf %cst_26, %71 : f32
      %76 = arith.divf %75, %73 : f32
      %77 = math.roundeven %76 : f32
      %78 = vector.broadcast %74 : f32 to vector<16x128xf32>
      %79 = arith.mulf %9, %78 : vector<16x128xf32>
      %80 = math.roundeven %79 : vector<16x128xf32>
      %81 = vector.broadcast %77 : f32 to vector<16x128xf32>
      %82 = arith.addf %80, %81 : vector<16x128xf32>
      %cst_27 = arith.constant 0.000000e+00 : f32
      %cst_28 = arith.constant 2.550000e+02 : f32
      %83 = vector.broadcast %cst_27 : f32 to vector<16x128xf32>
      %84 = arith.maximumf %83, %82 : vector<16x128xf32>
      %85 = vector.broadcast %cst_28 : f32 to vector<16x128xf32>
      %86 = arith.minimumf %85, %84 : vector<16x128xf32>
      %87 = vector.broadcast %77 : f32 to vector<16x128xf32>
      %88 = arith.subf %86, %87 : vector<16x128xf32>
      %89 = vector.broadcast %73 : f32 to vector<16x128xf32>
      %90 = arith.mulf %88, %89 : vector<16x128xf32>
      %91 = arith.subf %9, %90 : vector<16x128xf32>
      %c2_29 = arith.constant 2 : index
      %92 = memref.load %arg7[%c2_29] : memref<9xf32, #tpu.memory_space<smem>>
      %93 = arith.mulf %91, %91 : vector<16x128xf32>
      %94 = vector.shape_cast %93 : vector<16x128xf32> to vector<1x16x128xf32>
      %cst_30 = arith.constant dense<0.000000e+00> : vector<1xf32>
      %95 = vector.multi_reduction <add>, %94, %cst_30 [1, 2] : vector<1x16x128xf32> to vector<1xf32>
      %96 = vector.shape_cast %95 : vector<1xf32> to vector<1x1x1xf32>
      %97 = vector.extract %96[0, 0, 0] : f32 from vector<1x1x1xf32>
      %98 = arith.addf %92, %97 : f32
      %c2_31 = arith.constant 2 : index
      %99 = memref.load %arg7[%c2_31] : memref<9xf32, #tpu.memory_space<smem>>
      memref.store %98, %arg7[%c2_31] : memref<9xf32, #tpu.memory_space<smem>>
      %c3 = arith.constant 3 : index
      %100 = memref.load %arg2[%c3] : memref<9xf32, #tpu.memory_space<smem>>
      %c3_32 = arith.constant 3 : index
      %101 = memref.load %arg3[%c3_32] : memref<9xf32, #tpu.memory_space<smem>>
      %102 = arith.subf %100, %101 : f32
      %cst_33 = arith.constant 2.550000e+02 : f32
      %103 = arith.divf %102, %cst_33 : f32
      %cst_34 = arith.constant 1.000000e+00 : f32
      %104 = arith.divf %cst_34, %103 : f32
      %cst_35 = arith.constant 0.000000e+00 : f32
      %105 = arith.subf %cst_35, %101 : f32
      %106 = arith.divf %105, %103 : f32
      %107 = math.roundeven %106 : f32
      %108 = vector.broadcast %104 : f32 to vector<16x128xf32>
      %109 = arith.mulf %9, %108 : vector<16x128xf32>
      %110 = math.roundeven %109 : vector<16x128xf32>
      %111 = vector.broadcast %107 : f32 to vector<16x128xf32>
      %112 = arith.addf %110, %111 : vector<16x128xf32>
      %cst_36 = arith.constant 0.000000e+00 : f32
      %cst_37 = arith.constant 2.550000e+02 : f32
      %113 = vector.broadcast %cst_36 : f32 to vector<16x128xf32>
      %114 = arith.maximumf %113, %112 : vector<16x128xf32>
      %115 = vector.broadcast %cst_37 : f32 to vector<16x128xf32>
      %116 = arith.minimumf %115, %114 : vector<16x128xf32>
      %117 = vector.broadcast %107 : f32 to vector<16x128xf32>
      %118 = arith.subf %116, %117 : vector<16x128xf32>
      %119 = vector.broadcast %103 : f32 to vector<16x128xf32>
      %120 = arith.mulf %118, %119 : vector<16x128xf32>
      %121 = arith.subf %9, %120 : vector<16x128xf32>
      %c3_38 = arith.constant 3 : index
      %122 = memref.load %arg7[%c3_38] : memref<9xf32, #tpu.memory_space<smem>>
      %123 = arith.mulf %121, %121 : vector<16x128xf32>
      %124 = vector.shape_cast %123 : vector<16x128xf32> to vector<1x16x128xf32>
      %cst_39 = arith.constant dense<0.000000e+00> : vector<1xf32>
      %125 = vector.multi_reduction <add>, %124, %cst_39 [1, 2] : vector<1x16x128xf32> to vector<1xf32>
      %126 = vector.shape_cast %125 : vector<1xf32> to vector<1x1x1xf32>
      %127 = vector.extract %126[0, 0, 0] : f32 from vector<1x1x1xf32>
      %128 = arith.addf %122, %127 : f32
      %c3_40 = arith.constant 3 : index
      %129 = memref.load %arg7[%c3_40] : memref<9xf32, #tpu.memory_space<smem>>
      memref.store %128, %arg7[%c3_40] : memref<9xf32, #tpu.memory_space<smem>>
      %c4 = arith.constant 4 : index
      %130 = memref.load %arg2[%c4] : memref<9xf32, #tpu.memory_space<smem>>
      %c4_41 = arith.constant 4 : index
      %131 = memref.load %arg3[%c4_41] : memref<9xf32, #tpu.memory_space<smem>>
      %132 = arith.subf %130, %131 : f32
      %cst_42 = arith.constant 2.550000e+02 : f32
      %133 = arith.divf %132, %cst_42 : f32
      %cst_43 = arith.constant 1.000000e+00 : f32
      %134 = arith.divf %cst_43, %133 : f32
      %cst_44 = arith.constant 0.000000e+00 : f32
      %135 = arith.subf %cst_44, %131 : f32
      %136 = arith.divf %135, %133 : f32
      %137 = math.roundeven %136 : f32
      %138 = vector.broadcast %134 : f32 to vector<16x128xf32>
      %139 = arith.mulf %9, %138 : vector<16x128xf32>
      %140 = math.roundeven %139 : vector<16x128xf32>
      %141 = vector.broadcast %137 : f32 to vector<16x128xf32>
      %142 = arith.addf %140, %141 : vector<16x128xf32>
      %cst_45 = arith.constant 0.000000e+00 : f32
      %cst_46 = arith.constant 2.550000e+02 : f32
      %143 = vector.broadcast %cst_45 : f32 to vector<16x128xf32>
      %144 = arith.maximumf %143, %142 : vector<16x128xf32>
      %145 = vector.broadcast %cst_46 : f32 to vector<16x128xf32>
      %146 = arith.minimumf %145, %144 : vector<16x128xf32>
      %147 = vector.broadcast %137 : f32 to vector<16x128xf32>
      %148 = arith.subf %146, %147 : vector<16x128xf32>
      %149 = vector.broadcast %133 : f32 to vector<16x128xf32>
      %150 = arith.mulf %148, %149 : vector<16x128xf32>
      %151 = arith.subf %9, %150 : vector<16x128xf32>
      %c4_47 = arith.constant 4 : index
      %152 = memref.load %arg7[%c4_47] : memref<9xf32, #tpu.memory_space<smem>>
      %153 = arith.mulf %151, %151 : vector<16x128xf32>
      %154 = vector.shape_cast %153 : vector<16x128xf32> to vector<1x16x128xf32>
      %cst_48 = arith.constant dense<0.000000e+00> : vector<1xf32>
      %155 = vector.multi_reduction <add>, %154, %cst_48 [1, 2] : vector<1x16x128xf32> to vector<1xf32>
      %156 = vector.shape_cast %155 : vector<1xf32> to vector<1x1x1xf32>
      %157 = vector.extract %156[0, 0, 0] : f32 from vector<1x1x1xf32>
      %158 = arith.addf %152, %157 : f32
      %c4_49 = arith.constant 4 : index
      %159 = memref.load %arg7[%c4_49] : memref<9xf32, #tpu.memory_space<smem>>
      memref.store %158, %arg7[%c4_49] : memref<9xf32, #tpu.memory_space<smem>>
      %c5 = arith.constant 5 : index
      %160 = memref.load %arg2[%c5] : memref<9xf32, #tpu.memory_space<smem>>
      %c5_50 = arith.constant 5 : index
      %161 = memref.load %arg3[%c5_50] : memref<9xf32, #tpu.memory_space<smem>>
      %162 = arith.subf %160, %161 : f32
      %cst_51 = arith.constant 2.550000e+02 : f32
      %163 = arith.divf %162, %cst_51 : f32
      %cst_52 = arith.constant 1.000000e+00 : f32
      %164 = arith.divf %cst_52, %163 : f32
      %cst_53 = arith.constant 0.000000e+00 : f32
      %165 = arith.subf %cst_53, %161 : f32
      %166 = arith.divf %165, %163 : f32
      %167 = math.roundeven %166 : f32
      %168 = vector.broadcast %164 : f32 to vector<16x128xf32>
      %169 = arith.mulf %9, %168 : vector<16x128xf32>
      %170 = math.roundeven %169 : vector<16x128xf32>
      %171 = vector.broadcast %167 : f32 to vector<16x128xf32>
      %172 = arith.addf %170, %171 : vector<16x128xf32>
      %cst_54 = arith.constant 0.000000e+00 : f32
      %cst_55 = arith.constant 2.550000e+02 : f32
      %173 = vector.broadcast %cst_54 : f32 to vector<16x128xf32>
      %174 = arith.maximumf %173, %172 : vector<16x128xf32>
      %175 = vector.broadcast %cst_55 : f32 to vector<16x128xf32>
      %176 = arith.minimumf %175, %174 : vector<16x128xf32>
      %177 = vector.broadcast %167 : f32 to vector<16x128xf32>
      %178 = arith.subf %176, %177 : vector<16x128xf32>
      %179 = vector.broadcast %163 : f32 to vector<16x128xf32>
      %180 = arith.mulf %178, %179 : vector<16x128xf32>
      %181 = arith.subf %9, %180 : vector<16x128xf32>
      %c5_56 = arith.constant 5 : index
      %182 = memref.load %arg7[%c5_56] : memref<9xf32, #tpu.memory_space<smem>>
      %183 = arith.mulf %181, %181 : vector<16x128xf32>
      %184 = vector.shape_cast %183 : vector<16x128xf32> to vector<1x16x128xf32>
      %cst_57 = arith.constant dense<0.000000e+00> : vector<1xf32>
      %185 = vector.multi_reduction <add>, %184, %cst_57 [1, 2] : vector<1x16x128xf32> to vector<1xf32>
      %186 = vector.shape_cast %185 : vector<1xf32> to vector<1x1x1xf32>
      %187 = vector.extract %186[0, 0, 0] : f32 from vector<1x1x1xf32>
      %188 = arith.addf %182, %187 : f32
      %c5_58 = arith.constant 5 : index
      %189 = memref.load %arg7[%c5_58] : memref<9xf32, #tpu.memory_space<smem>>
      memref.store %188, %arg7[%c5_58] : memref<9xf32, #tpu.memory_space<smem>>
      %c6 = arith.constant 6 : index
      %190 = memref.load %arg2[%c6] : memref<9xf32, #tpu.memory_space<smem>>
      %c6_59 = arith.constant 6 : index
      %191 = memref.load %arg3[%c6_59] : memref<9xf32, #tpu.memory_space<smem>>
      %192 = arith.subf %190, %191 : f32
      %cst_60 = arith.constant 2.550000e+02 : f32
      %193 = arith.divf %192, %cst_60 : f32
      %cst_61 = arith.constant 1.000000e+00 : f32
      %194 = arith.divf %cst_61, %193 : f32
      %cst_62 = arith.constant 0.000000e+00 : f32
      %195 = arith.subf %cst_62, %191 : f32
      %196 = arith.divf %195, %193 : f32
      %197 = math.roundeven %196 : f32
      %198 = vector.broadcast %194 : f32 to vector<16x128xf32>
      %199 = arith.mulf %9, %198 : vector<16x128xf32>
      %200 = math.roundeven %199 : vector<16x128xf32>
      %201 = vector.broadcast %197 : f32 to vector<16x128xf32>
      %202 = arith.addf %200, %201 : vector<16x128xf32>
      %cst_63 = arith.constant 0.000000e+00 : f32
      %cst_64 = arith.constant 2.550000e+02 : f32
      %203 = vector.broadcast %cst_63 : f32 to vector<16x128xf32>
      %204 = arith.maximumf %203, %202 : vector<16x128xf32>
      %205 = vector.broadcast %cst_64 : f32 to vector<16x128xf32>
      %206 = arith.minimumf %205, %204 : vector<16x128xf32>
      %207 = vector.broadcast %197 : f32 to vector<16x128xf32>
      %208 = arith.subf %206, %207 : vector<16x128xf32>
      %209 = vector.broadcast %193 : f32 to vector<16x128xf32>
      %210 = arith.mulf %208, %209 : vector<16x128xf32>
      %211 = arith.subf %9, %210 : vector<16x128xf32>
      %c6_65 = arith.constant 6 : index
      %212 = memref.load %arg7[%c6_65] : memref<9xf32, #tpu.memory_space<smem>>
      %213 = arith.mulf %211, %211 : vector<16x128xf32>
      %214 = vector.shape_cast %213 : vector<16x128xf32> to vector<1x16x128xf32>
      %cst_66 = arith.constant dense<0.000000e+00> : vector<1xf32>
      %215 = vector.multi_reduction <add>, %214, %cst_66 [1, 2] : vector<1x16x128xf32> to vector<1xf32>
      %216 = vector.shape_cast %215 : vector<1xf32> to vector<1x1x1xf32>
      %217 = vector.extract %216[0, 0, 0] : f32 from vector<1x1x1xf32>
      %218 = arith.addf %212, %217 : f32
      %c6_67 = arith.constant 6 : index
      %219 = memref.load %arg7[%c6_67] : memref<9xf32, #tpu.memory_space<smem>>
      memref.store %218, %arg7[%c6_67] : memref<9xf32, #tpu.memory_space<smem>>
      %c7 = arith.constant 7 : index
      %220 = memref.load %arg2[%c7] : memref<9xf32, #tpu.memory_space<smem>>
      %c7_68 = arith.constant 7 : index
      %221 = memref.load %arg3[%c7_68] : memref<9xf32, #tpu.memory_space<smem>>
      %222 = arith.subf %220, %221 : f32
      %cst_69 = arith.constant 2.550000e+02 : f32
      %223 = arith.divf %222, %cst_69 : f32
      %cst_70 = arith.constant 1.000000e+00 : f32
      %224 = arith.divf %cst_70, %223 : f32
      %cst_71 = arith.constant 0.000000e+00 : f32
      %225 = arith.subf %cst_71, %221 : f32
      %226 = arith.divf %225, %223 : f32
      %227 = math.roundeven %226 : f32
      %228 = vector.broadcast %224 : f32 to vector<16x128xf32>
      %229 = arith.mulf %9, %228 : vector<16x128xf32>
      %230 = math.roundeven %229 : vector<16x128xf32>
      %231 = vector.broadcast %227 : f32 to vector<16x128xf32>
      %232 = arith.addf %230, %231 : vector<16x128xf32>
      %cst_72 = arith.constant 0.000000e+00 : f32
      %cst_73 = arith.constant 2.550000e+02 : f32
      %233 = vector.broadcast %cst_72 : f32 to vector<16x128xf32>
      %234 = arith.maximumf %233, %232 : vector<16x128xf32>
      %235 = vector.broadcast %cst_73 : f32 to vector<16x128xf32>
      %236 = arith.minimumf %235, %234 : vector<16x128xf32>
      %237 = vector.broadcast %227 : f32 to vector<16x128xf32>
      %238 = arith.subf %236, %237 : vector<16x128xf32>
      %239 = vector.broadcast %223 : f32 to vector<16x128xf32>
      %240 = arith.mulf %238, %239 : vector<16x128xf32>
      %241 = arith.subf %9, %240 : vector<16x128xf32>
      %c7_74 = arith.constant 7 : index
      %242 = memref.load %arg7[%c7_74] : memref<9xf32, #tpu.memory_space<smem>>
      %243 = arith.mulf %241, %241 : vector<16x128xf32>
      %244 = vector.shape_cast %243 : vector<16x128xf32> to vector<1x16x128xf32>
      %cst_75 = arith.constant dense<0.000000e+00> : vector<1xf32>
      %245 = vector.multi_reduction <add>, %244, %cst_75 [1, 2] : vector<1x16x128xf32> to vector<1xf32>
      %246 = vector.shape_cast %245 : vector<1xf32> to vector<1x1x1xf32>
      %247 = vector.extract %246[0, 0, 0] : f32 from vector<1x1x1xf32>
      %248 = arith.addf %242, %247 : f32
      %c7_76 = arith.constant 7 : index
      %249 = memref.load %arg7[%c7_76] : memref<9xf32, #tpu.memory_space<smem>>
      memref.store %248, %arg7[%c7_76] : memref<9xf32, #tpu.memory_space<smem>>
      %c8 = arith.constant 8 : index
      %250 = memref.load %arg2[%c8] : memref<9xf32, #tpu.memory_space<smem>>
      %c8_77 = arith.constant 8 : index
      %251 = memref.load %arg3[%c8_77] : memref<9xf32, #tpu.memory_space<smem>>
      %252 = arith.subf %250, %251 : f32
      %cst_78 = arith.constant 2.550000e+02 : f32
      %253 = arith.divf %252, %cst_78 : f32
      %cst_79 = arith.constant 1.000000e+00 : f32
      %254 = arith.divf %cst_79, %253 : f32
      %cst_80 = arith.constant 0.000000e+00 : f32
      %255 = arith.subf %cst_80, %251 : f32
      %256 = arith.divf %255, %253 : f32
      %257 = math.roundeven %256 : f32
      %258 = vector.broadcast %254 : f32 to vector<16x128xf32>
      %259 = arith.mulf %9, %258 : vector<16x128xf32>
      %260 = math.roundeven %259 : vector<16x128xf32>
      %261 = vector.broadcast %257 : f32 to vector<16x128xf32>
      %262 = arith.addf %260, %261 : vector<16x128xf32>
      %cst_81 = arith.constant 0.000000e+00 : f32
      %cst_82 = arith.constant 2.550000e+02 : f32
      %263 = vector.broadcast %cst_81 : f32 to vector<16x128xf32>
      %264 = arith.maximumf %263, %262 : vector<16x128xf32>
      %265 = vector.broadcast %cst_82 : f32 to vector<16x128xf32>
      %266 = arith.minimumf %265, %264 : vector<16x128xf32>
      %267 = vector.broadcast %257 : f32 to vector<16x128xf32>
      %268 = arith.subf %266, %267 : vector<16x128xf32>
      %269 = vector.broadcast %253 : f32 to vector<16x128xf32>
      %270 = arith.mulf %268, %269 : vector<16x128xf32>
      %271 = arith.subf %9, %270 : vector<16x128xf32>
      %c8_83 = arith.constant 8 : index
      %272 = memref.load %arg7[%c8_83] : memref<9xf32, #tpu.memory_space<smem>>
      %273 = arith.mulf %271, %271 : vector<16x128xf32>
      %274 = vector.shape_cast %273 : vector<16x128xf32> to vector<1x16x128xf32>
      %cst_84 = arith.constant dense<0.000000e+00> : vector<1xf32>
      %275 = vector.multi_reduction <add>, %274, %cst_84 [1, 2] : vector<1x16x128xf32> to vector<1xf32>
      %276 = vector.shape_cast %275 : vector<1xf32> to vector<1x1x1xf32>
      %277 = vector.extract %276[0, 0, 0] : f32 from vector<1x1x1xf32>
      %278 = arith.addf %272, %277 : f32
      %c8_85 = arith.constant 8 : index
      %279 = memref.load %arg7[%c8_85] : memref<9xf32, #tpu.memory_space<smem>>
      memref.store %278, %arg7[%c8_85] : memref<9xf32, #tpu.memory_space<smem>>
      %c0_i32_86 = arith.constant 0 : i32
      %280 = arith.cmpi eq, %arg1, %c0_i32_86 : i32
      %281 = arith.extui %280 : i1 to i32
      %c0_i32_87 = arith.constant 0 : i32
      %282 = arith.cmpi ne, %281, %c0_i32_87 : i32
      scf.if %282 {
        %c0_88 = arith.constant 0 : index
        %283 = memref.load %arg7[%c0_88] : memref<9xf32, #tpu.memory_space<smem>>
        %c0_89 = arith.constant 0 : index
        %284 = memref.load %arg2[%c0_89] : memref<9xf32, #tpu.memory_space<smem>>
        %c0_90 = arith.constant 0 : index
        %285 = memref.load %arg3[%c0_90] : memref<9xf32, #tpu.memory_space<smem>>
        %c1_91 = arith.constant 1 : index
        %286 = memref.load %arg7[%c1_91] : memref<9xf32, #tpu.memory_space<smem>>
        %287 = arith.cmpf olt, %286, %283 : f32
        %288 = arith.select %287, %286, %283 : f32
        %c1_92 = arith.constant 1 : index
        %289 = memref.load %arg2[%c1_92] : memref<9xf32, #tpu.memory_space<smem>>
        %290 = arith.select %287, %289, %284 : f32
        %c1_93 = arith.constant 1 : index
        %291 = memref.load %arg3[%c1_93] : memref<9xf32, #tpu.memory_space<smem>>
        %292 = arith.select %287, %291, %285 : f32
        %c2_94 = arith.constant 2 : index
        %293 = memref.load %arg7[%c2_94] : memref<9xf32, #tpu.memory_space<smem>>
        %294 = arith.cmpf olt, %293, %288 : f32
        %295 = arith.select %294, %293, %288 : f32
        %c2_95 = arith.constant 2 : index
        %296 = memref.load %arg2[%c2_95] : memref<9xf32, #tpu.memory_space<smem>>
        %297 = arith.select %294, %296, %290 : f32
        %c2_96 = arith.constant 2 : index
        %298 = memref.load %arg3[%c2_96] : memref<9xf32, #tpu.memory_space<smem>>
        %299 = arith.select %294, %298, %292 : f32
        %c3_97 = arith.constant 3 : index
        %300 = memref.load %arg7[%c3_97] : memref<9xf32, #tpu.memory_space<smem>>
        %301 = arith.cmpf olt, %300, %295 : f32
        %302 = arith.select %301, %300, %295 : f32
        %c3_98 = arith.constant 3 : index
        %303 = memref.load %arg2[%c3_98] : memref<9xf32, #tpu.memory_space<smem>>
        %304 = arith.select %301, %303, %297 : f32
        %c3_99 = arith.constant 3 : index
        %305 = memref.load %arg3[%c3_99] : memref<9xf32, #tpu.memory_space<smem>>
        %306 = arith.select %301, %305, %299 : f32
        %c4_100 = arith.constant 4 : index
        %307 = memref.load %arg7[%c4_100] : memref<9xf32, #tpu.memory_space<smem>>
        %308 = arith.cmpf olt, %307, %302 : f32
        %309 = arith.select %308, %307, %302 : f32
        %c4_101 = arith.constant 4 : index
        %310 = memref.load %arg2[%c4_101] : memref<9xf32, #tpu.memory_space<smem>>
        %311 = arith.select %308, %310, %304 : f32
        %c4_102 = arith.constant 4 : index
        %312 = memref.load %arg3[%c4_102] : memref<9xf32, #tpu.memory_space<smem>>
        %313 = arith.select %308, %312, %306 : f32
        %c5_103 = arith.constant 5 : index
        %314 = memref.load %arg7[%c5_103] : memref<9xf32, #tpu.memory_space<smem>>
        %315 = arith.cmpf olt, %314, %309 : f32
        %316 = arith.select %315, %314, %309 : f32
        %c5_104 = arith.constant 5 : index
        %317 = memref.load %arg2[%c5_104] : memref<9xf32, #tpu.memory_space<smem>>
        %318 = arith.select %315, %317, %311 : f32
        %c5_105 = arith.constant 5 : index
        %319 = memref.load %arg3[%c5_105] : memref<9xf32, #tpu.memory_space<smem>>
        %320 = arith.select %315, %319, %313 : f32
        %c6_106 = arith.constant 6 : index
        %321 = memref.load %arg7[%c6_106] : memref<9xf32, #tpu.memory_space<smem>>
        %322 = arith.cmpf olt, %321, %316 : f32
        %323 = arith.select %322, %321, %316 : f32
        %c6_107 = arith.constant 6 : index
        %324 = memref.load %arg2[%c6_107] : memref<9xf32, #tpu.memory_space<smem>>
        %325 = arith.select %322, %324, %318 : f32
        %c6_108 = arith.constant 6 : index
        %326 = memref.load %arg3[%c6_108] : memref<9xf32, #tpu.memory_space<smem>>
        %327 = arith.select %322, %326, %320 : f32
        %c7_109 = arith.constant 7 : index
        %328 = memref.load %arg7[%c7_109] : memref<9xf32, #tpu.memory_space<smem>>
        %329 = arith.cmpf olt, %328, %323 : f32
        %330 = arith.select %329, %328, %323 : f32
        %c7_110 = arith.constant 7 : index
        %331 = memref.load %arg2[%c7_110] : memref<9xf32, #tpu.memory_space<smem>>
        %332 = arith.select %329, %331, %325 : f32
        %c7_111 = arith.constant 7 : index
        %333 = memref.load %arg3[%c7_111] : memref<9xf32, #tpu.memory_space<smem>>
        %334 = arith.select %329, %333, %327 : f32
        %c8_112 = arith.constant 8 : index
        %335 = memref.load %arg7[%c8_112] : memref<9xf32, #tpu.memory_space<smem>>
        %336 = arith.cmpf olt, %335, %330 : f32
        %c8_113 = arith.constant 8 : index
        %337 = memref.load %arg2[%c8_113] : memref<9xf32, #tpu.memory_space<smem>>
        %338 = arith.select %336, %337, %332 : f32
        %c8_114 = arith.constant 8 : index
        %339 = memref.load %arg3[%c8_114] : memref<9xf32, #tpu.memory_space<smem>>
        %340 = arith.select %336, %339, %334 : f32
        %341 = arith.subf %338, %340 : f32
        %cst_115 = arith.constant 2.550000e+02 : f32
        %342 = arith.divf %341, %cst_115 : f32
        %cst_116 = arith.constant 0.000000e+00 : f32
        %343 = arith.subf %cst_116, %340 : f32
        %344 = arith.divf %343, %342 : f32
        %345 = math.roundeven %344 : f32
        %c0_117 = arith.constant 0 : index
        %346 = memref.load %arg6[%c0_117] : memref<2xf32, #tpu.memory_space<smem>>
        memref.store %342, %arg6[%c0_117] : memref<2xf32, #tpu.memory_space<smem>>
        %c1_118 = arith.constant 1 : index
        %347 = memref.load %arg6[%c1_118] : memref<2xf32, #tpu.memory_space<smem>>
        memref.store %345, %arg6[%c1_118] : memref<2xf32, #tpu.memory_space<smem>>
      } else {
      }
    } else {
    }
    %c1_i32 = arith.constant 1 : i32
    %3 = arith.cmpi eq, %arg0, %c1_i32 : i32
    %4 = arith.extui %3 : i1 to i32
    %c0_i32_1 = arith.constant 0 : i32
    %5 = arith.cmpi ne, %4, %c0_i32_1 : i32
    scf.if %5 {
      %c0 = arith.constant 0 : index
      %6 = memref.load %arg6[%c0] : memref<2xf32, #tpu.memory_space<smem>>
      %c1 = arith.constant 1 : index
      %7 = memref.load %arg6[%c1] : memref<2xf32, #tpu.memory_space<smem>>
      %cst = arith.constant 1.000000e+00 : f32
      %8 = arith.divf %cst, %6 : f32
      %c0_2 = arith.constant 0 : index
      %c0_3 = arith.constant 0 : index
      %9 = vector.load %arg4[%c0_2, %c0_3] : memref<16x128xf32, #tpu.memory_space<vmem>>, vector<16x128xf32>
      %10 = vector.broadcast %8 : f32 to vector<16x128xf32>
      %11 = arith.mulf %9, %10 : vector<16x128xf32>
      %12 = math.roundeven %11 : vector<16x128xf32>
      %13 = vector.broadcast %7 : f32 to vector<16x128xf32>
      %14 = arith.addf %12, %13 : vector<16x128xf32>
      %cst_4 = arith.constant 0.000000e+00 : f32
      %cst_5 = arith.constant 2.550000e+02 : f32
      %15 = vector.broadcast %cst_4 : f32 to vector<16x128xf32>
      %16 = arith.maximumf %15, %14 : vector<16x128xf32>
      %17 = vector.broadcast %cst_5 : f32 to vector<16x128xf32>
      %18 = arith.minimumf %17, %16 : vector<16x128xf32>
      %19 = vector.broadcast %7 : f32 to vector<16x128xf32>
      %20 = arith.subf %18, %19 : vector<16x128xf32>
      %21 = vector.broadcast %6 : f32 to vector<16x128xf32>
      %22 = arith.mulf %20, %21 : vector<16x128xf32>
      %c0_6 = arith.constant 0 : index
      %c0_7 = arith.constant 0 : index
      %23 = vector.load %arg5[%c0_6, %c0_7] : memref<16x128xf32, #tpu.memory_space<vmem>>, vector<16x128xf32>
      tpu.vector_store %arg5[%c0_6, %c0_7], %22 {strides = array<i32>} : memref<16x128xf32, #tpu.memory_space<vmem>>, vector<16x128xf32>,
    } else {
    }
    return
  }
  func.func @transform_0(%arg0: i32, %arg1: i32) -> i32 {
    %c0_i32 = arith.constant 0 : i32
    %c0_i32_0 = arith.constant 0 : i32
    return %c0_i32 : i32
  }
  func.func @transform_1(%arg0: i32, %arg1: i32) -> i32 {
    %c0_i32 = arith.constant 0 : i32
    %c0_i32_0 = arith.constant 0 : i32
    return %c0_i32 : i32
  }
  func.func @transform_2(%arg0: i32, %arg1: i32) -> (i32, i32) {
    %c0_i32 = arith.constant 0 : i32
    %c0_i32_0 = arith.constant 0 : i32
    return %arg1, %c0_i32 : i32, i32
  }
  func.func @transform_3(%arg0: i32, %arg1: i32) -> (i32, i32) {
    %0 = arith.muli %arg1, %arg0 : i32
    %c0_i32 = arith.constant 0 : i32
    %c0_i32_0 = arith.constant 0 : i32
    return %0, %c0_i32 : i32, i32
  }
  func.func @transform_4(%arg0: i32, %arg1: i32) -> i32 {
    %c0_i32 = arith.constant 0 : i32
    %c0_i32_0 = arith.constant 0 : i32
    return %c0_i32 : i32
  }
}

</mosaic_0001>

<bundles_post_ra>
// kernel: tpu_custom_call.1
= control target key start
LH: loop header
LB: loop body
LE: loop exit
PB: predicated region body
PF: predicated region fallthrough
CT: control target
= control target key end

     0   :  { %10 = vsyncpa [#allocation6], 0  ;;  %s1780_s0 = inlined_call_operand.hbm [shape: f32[9], index: 0, kind: input, shape index: {}]   ;;  %s1781_s1 = inlined_call_operand.vmem [shape: f32[9], index: 1, kind: input, shape index: {}]   ;;  %s1782_s2 = inlined_call_operand.hbm [shape: f32[16,128], index: 2, kind: input, shape index: {}]   ;;  %s1783_s3 = inlined_call_operand.hbm [shape: f32[16,128], index: 3, kind: output, shape index: {0}]   ;;  %s1784_s4 = inlined_call_operand.hbm [shape: f32[2], index: 4, kind: output, shape index: {1}]  }
   0x1   :  { %11 = vsyncpa [#allocation8], 0 }
   0x2   :  { %12 = vsyncpa [#allocation4], 0 }
   0x3   :  { %13 = vsyncpa [#allocation5], 0 }
   0x4   :  { %15 = vsyncpa [#allocation5 + $0x1], 0 }
   0x5   :  { %16 = vsyncpa [#allocation7], 0  ;;  %s1426_s15 = smov 0   ;;  %s1428_s16 = smov 0  }
   0x6   :  { %s1430_s17 = smov 0  }
   0x7 LB: > { %s1027_s18 = sadd.s32 4294967295, %s1390_s17   ;;  %s1028_s19 = sadd.s32 4294967294, %s1390_s17   ;;  %s1390_s17 = sphi %s1430_s17, %s22_s17   ;;  %s1386_s16 = sphi %s1428_s16, %s1790_s16   ;;  %s1382_s15 = sphi %s1426_s15, %s1789_s15  }
   0x8   : > { %s34_s20 = sadd.s32 1, %s1386_s16  ;;  %p1029_p0 = scmp.ge.s32.totalorder %s1390_s17, 1 }
   0x9   : > { %p36_p1 = scmp.ge.s32.totalorder %s34_s20, 2  ;;  %p156_p2 = scmp.lt.s32.totalorder %s1390_s17, 3 }
   0xa   : > { %p1454_p4 = scmp.eq.s32.totalorder %s1027_s18, 0  ;;  %s178_s25 = sshll.u32 %s1781_s1, 4  ;;  %s179_s25 = int_to_ptr.vmem [resolvable:$true] %s178_s25 }
   0xb   : > { %s1792_s20 = smov (%p36_p1, %s34_s20), 0  ;;  %p1448_p3 = pnand %p1029_p0, %p156_p2 }
   0xc   : > { %s1392_s27 = smov [#allocation10]   ;;  %s1254_s5 = scalar_lea.hbm %s1780_s0, 16 }
   0xd   : > { %p1174_p5 = pneg %p1448_p3  ;;  %s191_s28 = sshll.u32 %s1392_s27, 4  ;;  %s1469_s28 = int_to_ptr.vmem [resolvable:$true] %s191_s28 }
   0xe   : > { %p1255_p7 = scmp.ne.s32.totalorder %s1780_s0, %s1254_s5  ;;  %p1261_p11 = scmp.lt.u32.totalorder %s1254_s5, %s1780_s0 }
   0xf   : > { %p1465_p6 = pnand %p1454_p4, %p1174_p5 }
  0x11   : > { %p1256_p8 = pneg %p1465_p6 }
  0x13   : > { %p1257_p9 = pnand %p1256_p8, %p1255_p7 }
  0x15   : > { %p1258_p10 = pneg %p1257_p9 }
  0x17   : > { %p1263_p12 = pnand %p1261_p11, %p1258_p10 }
  0x19   : > { %1266 = shalt.err (!%p1263_p12)
}
  0x1a   : > { %s1393_s10 = smov [#allocation3]   ;;  %s1267_s13 = scalar_lea.vmem %s179_s25, 16 }
  0x1b   : > { %1177 = dma.hbm_to_smem (!%p1465_p6), %s1780_s0, 16, %s1393_s10, [#allocation6]  }
  0x1c   : > { %p1268_p13 = scmp.ne.s32.totalorder %s179_s25, %s1267_s13  ;;  %p1275_p2 = scmp.lt.s32.totalorder %s179_s25, %s179_s25 }
  0x1d   : > { %p1276_p5 = scmp.lt.s32.totalorder %s1267_s13, %s1267_s13 }
  0x1e   : > { %p1270_p0 = pnand %p1268_p13, %p1256_p8 }
  0x1f   : > { %p1277_p7 = por %p1276_p5, %p1275_p2 }
  0x20   : > { %p1271_p1 = pneg %p1270_p0 }
  0x22   : > { %p1278_p9 = pnand %p1277_p7, %p1271_p1 }
  0x24   : > { %1281 = shalt.err (!%p1278_p9)
}
  0x25   : > { %s1394_s14 = smov [#allocation9]   ;;  %s1282_s27 = scalar_lea.hbm %s1782_s2, 256 }
  0x26   : > { %1180 = dma.vmem_to_smem (!%p1465_p6), %s179_s25, 16, %s1394_s14, [#allocation8]  }
  0x27   : > { %p1283_p10 = scmp.ne.s32.totalorder %s1782_s2, %s1282_s27  ;;  %p1289_p13 = scmp.lt.u32.totalorder %s1282_s27, %s1782_s2 }
  0x29   : > { %p1285_p11 = pnand %p1283_p10, %p1256_p8 }
  0x2b   : > { %p1286_p12 = pneg %p1285_p11 }
  0x2d   : > { %p1291_p0 = pnand %p1289_p13, %p1286_p12 }
  0x2f   : > { %1294 = shalt.err (!%p1291_p0)
}
  0x30   : > { %s1295_s25 = scalar_lea.vmem %s1469_s28, 256  ;;  %p1303_p7 = scmp.lt.s32.totalorder %s1469_s28, %s1469_s28 }
  0x31   : > { %p1296_p1 = scmp.ne.s32.totalorder %s1469_s28, %s1295_s25  ;;  %p1304_p9 = scmp.lt.s32.totalorder %s1295_s25, %s1295_s25 }
  0x33   : > { %p1298_p2 = pnand %p1296_p1, %p1256_p8  ;;  %p1305_p10 = por %p1304_p9, %p1303_p7 }
  0x35   : > { %p1299_p5 = pneg %p1298_p2 }
  0x37   : > { %p1306_p11 = pnand %p1305_p10, %p1299_p5 }
  0x39   : > { %1309 = shalt.err (!%p1306_p11)
}
  0x3a   : > { %s1395_s7 = smov 128   ;;  %s1396_s8 = smov 8  }
  0x3b   : > { %1183 = dma.hbm_to_vmem [thread:$0]  (!%p1465_p6), %s1782_s2, 256, %s1469_s28, [#allocation4], %s1395_s7, %s1395_s7, %s1396_s8  }
  0x3c   : > { %207 = sbr.rel (%p1448_p3) target bundleno = 2429 (0x97d), region = 32 }
  0x43   : > { %1361 = dma.done.wait (%p1454_p4), [#allocation6], 16  }
  0x44   : > { %1363 = vsyncadd (%p1454_p4), [#allocation6], 4294967280 }
  0x45   : > { %1365 = dma.done.wait (%p1454_p4), [#allocation8], 16  }
  0x46   : > { %1367 = vsyncadd (%p1454_p4), [#allocation8], 4294967280 }
  0x47   : > { %1369 = dma.done.wait (%p1454_p4), [#allocation4], 256  }
  0x48   : > { %1371 = vsyncadd (%p1454_p4), [#allocation4], 4294967040 }
  0x49   : > { %221 = sfence }
  0x4a   : > { %p1037_p3 = scmp.ne.s32.totalorder %s1382_s15, 0 }
  0x4b   : > { %s1535_s21 = sld [smem:[#allocation3]] (!%p1037_p3)  ;;  %v1542_v2 = vld [vmem:[#allocation10] sm:$0xff] (!%p1037_p3)  ;;  %v1544_v3 = vld [vmem:[#allocation10 + $0x8] sm:$0xff] (!%p1037_p3)  ;;  %s1550_s5 = sld [smem:[#allocation3 + $0x1]] (!%p1037_p3) }
  0x4c   : > { %243 = sbr.rel (%p1037_p3) target bundleno = 2305 (0x901), region = 48  ;;  %s1537_s26 = sld [smem:[#allocation9]] (!%p1037_p3) }
  0x4d   : > { %s1552_s6 = sld [smem:[#allocation9 + $0x1]] (!%p1037_p3) }
  0x52   : > { %s270_s28 = ssub.f32 (!%p1037_p3), %s1535_s21, %s1537_s26 }
  0x53   : > { %s277_s12 = ssub.f32 0.0, %s1537_s26 }
  0x54   : > { %s273_s11 = smul.f32 0.003921569, %s270_s28  ;;  %s327_s25 = ssub.f32 %s1550_s5, %s1552_s6 }
  0x55   : > { %s334_s8 = ssub.f32 0.0, %s1552_s6 }
  0x56   : > { %v274_v0 = vstv %s273_s11  ;;  %s330_s7 = smul.f32 0.003921569, %s327_s25 }
  0x57   : > { %1232 = vrcp.f32 %v274_v0 }
  0x58   : > { %v331_v25 = vstv %s330_s7 }
  0x59   : > { %1234 = vrcp.f32 %v331_v25 }
  0x61   : > { %v1233_v1 = vpop.eup %1232 }
  0x62   : > { %1094 = vpush %v1233_v1 }
  0x63   : > { %v1235_v32 = vpop.eup %1234 }
  0x93   : > { %s1095_s22 = spop %1094 }
  0x94   : > { %s281_s13 = smul.f32 %s1095_s22, %s277_s12  ;;  %v290_v4 = vstv %s1095_s22 }
  0x95   : > { %v291_v5 = vmul.f32 %v290_v4, %v1542_v2  ;;  %v292_v6 = vmul.f32 %v290_v4, %v1544_v3 }
  0x96   : > { %s282_s14 = scvt.f32.s32 %s281_s13  ;;  %s287_s23 = sand.u32 2147483647, %s281_s13 }
  0x97   : > { %s285_s27 = sand.u32 2147483648, %s281_s13  ;;  %p288_p4 = scmp.lt.f32.partialorder %s287_s23, 2.1474836e+09  ;;  %v1096_v7 = vround.rtne.f32 %v291_v5  ;;  %v1097_v8 = vround.rtne.f32 %v292_v6 }
  0x98   : > { %s283_s24 = scvt.s32.f32 %s282_s14 }
  0x9a   : > { %s284_s29 = sand.u32 2147483647, %s283_s24  ;;  %s1563_s24 = sld [smem:[#allocation3 + $0x2]] }
  0x9b   : > { %s286_s30 = sor.u32 %s285_s27, %s284_s29  ;;  %s1565_s27 = sld [smem:[#allocation9 + $0x2]] }
  0x9c   : > { %s1794_s30 = smov (!%p288_p4, %s286_s30), %s281_s13 }
  0x9d   : > { %v295_v9 = vstv %s1794_s30 }
  0x9e   : > { %v296_v10 = vadd.f32 %v1096_v7, %v295_v9  ;;  %v297_v11 = vadd.f32 %v1097_v8, %v295_v9 }
  0xa0   : > { %v298_v12 = vmax.f32 %v296_v10, 0.0  ;;  %v299_v13 = vmax.f32 %v297_v11, 0.0 }
  0xa1   : > { %s384_s29 = ssub.f32 %s1563_s24, %s1565_s27 }
  0xa2   : > { %v300_v14 = vmin.f32 %v298_v12, 255.0  ;;  %v301_v15 = vmin.f32 %v299_v13, 255.0  ;;  %s391_s25 = ssub.f32 0.0, %s1565_s27 }
  0xa3   : > { %s387_s30 = smul.f32 0.003921569, %s384_s29  ;;  %s1578_s29 = sld [smem:[#allocation9 + $0x3]] }
  0xa4   : > { %v302_v16 = vsub.f32 %v300_v14, %v295_v9  ;;  %v303_v17 = vsub.f32 %v301_v15, %v295_v9 }
  0xa5   : > { %v388_v55 = vstv %s387_s30 }
  0xa6   : > { %v305_v18 = vmul.f32 %v302_v16, %v274_v0  ;;  %v306_v19 = vmul.f32 %v303_v17, %v274_v0  ;;  %1236 = vrcp.f32 %v388_v55 }
  0xa8   : > { %v307_v20 = vsub.f32 %v1542_v2, %v305_v18  ;;  %v308_v21 = vsub.f32 %v1544_v3, %v306_v19 }
  0xaa   : > { %v310_v22 = vmul.f32 %v307_v20, %v307_v20  ;;  %v311_v23 = vmul.f32 %v308_v21, %v308_v21 }
  0xac   : > { %v312_v24 = vadd.f32 %v311_v23, %v310_v22 }
  0xae   : > { %313 = vadd.xlane.f32.xlu0 %v312_v24 }
  0xb0   : > { %v1237_v62 = vpop.eup %1236 }
 0x13b   : > { %v314_v26 = vpop.xlane.xlu0 %313 }
 0x13c   : > { %v315_v27 = vrot.slane %v314_v26, 4 }
 0x13e   : > { %v316_v28 = vadd.f32 %v315_v27, %v314_v26 }
 0x140   : > { %v317_v29 = vrot.slane %v316_v28, 2 }
 0x142   : > { %v318_v30 = vadd.f32 %v317_v29, %v316_v28 }
 0x144   : > { %v319_v31 = vrot.slane %v318_v30, 1 }
 0x146   : > { %v320_v33 = vadd.f32 %v319_v31, %v318_v30 }
 0x148   : > { %1098 = vpush %v320_v33 }
 0x149   : > { %1100 = vpush %v1235_v32 }
 0x179   : > { %s1557_s9 = spop %1098 }
 0x17a   : > { %s1101_s10 = spop %1100 }
 0x17b   : > { %s338_s28 = smul.f32 %s1101_s10, %s334_s8  ;;  %v347_v34 = vstv %s1101_s10 }
 0x17c   : > { %v348_v35 = vmul.f32 %v347_v34, %v1542_v2  ;;  %v349_v36 = vmul.f32 %v347_v34, %v1544_v3 }
 0x17d   : > { %s339_s11 = scvt.f32.s32 %s338_s28  ;;  %s344_s12 = sand.u32 2147483647, %s338_s28 }
 0x17e   : > { %s342_s13 = sand.u32 2147483648, %s338_s28  ;;  %p345_p6 = scmp.lt.f32.partialorder %s344_s12, 2.1474836e+09  ;;  %v1102_v37 = vround.rtne.f32 %v348_v35  ;;  %v1103_v38 = vround.rtne.f32 %v349_v36 }
 0x17f   : > { %s340_s22 = scvt.s32.f32 %s339_s11 }
 0x181   : > { %s341_s14 = sand.u32 2147483647, %s340_s22 }
 0x182   : > { %s343_s23 = sor.u32 %s342_s13, %s341_s14 }
 0x183   : > { %s1796_s23 = smov (!%p345_p6, %s343_s23), %s338_s28 }
 0x184   : > { %v352_v39 = vstv %s1796_s23  ;;  %s1576_s23 = sld [smem:[#allocation3 + $0x3]] }
 0x185   : > { %v353_v40 = vadd.f32 %v1102_v37, %v352_v39  ;;  %v354_v41 = vadd.f32 %v1103_v38, %v352_v39 }
 0x187   : > { %v355_v42 = vmax.f32 %v353_v40, 0.0  ;;  %v356_v43 = vmax.f32 %v354_v41, 0.0 }
 0x189   : > { %v357_v44 = vmin.f32 %v355_v42, 255.0  ;;  %v358_v45 = vmin.f32 %v356_v43, 255.0 }
 0x18a   : > { %s441_s30 = ssub.f32 %s1576_s23, %s1578_s29 }
 0x18b   : > { %v359_v46 = vsub.f32 %v357_v44, %v352_v39  ;;  %v360_v47 = vsub.f32 %v358_v45, %v352_v39 }
 0x18d   : > { %v362_v48 = vmul.f32 %v359_v46, %v331_v25  ;;  %v363_v49 = vmul.f32 %v360_v47, %v331_v25 }
 0x18f   : > { %v364_v50 = vsub.f32 %v1542_v2, %v362_v48  ;;  %v365_v51 = vsub.f32 %v1544_v3, %v363_v49 }
 0x191   : > { %v367_v52 = vmul.f32 %v364_v50, %v364_v50  ;;  %v368_v53 = vmul.f32 %v365_v51, %v365_v51 }
 0x193   : > { %v369_v54 = vadd.f32 %v368_v53, %v367_v52 }
 0x195   : > { %370 = vadd.xlane.f32.xlu0 %v369_v54 }
 0x222   : > { %v371_v56 = vpop.xlane.xlu0 %370 }
 0x223   : > { %v372_v57 = vrot.slane %v371_v56, 4 }
 0x225   : > { %v373_v58 = vadd.f32 %v372_v57, %v371_v56 }
 0x227   : > { %v374_v59 = vrot.slane %v373_v58, 2 }
 0x229   : > { %v375_v60 = vadd.f32 %v374_v59, %v373_v58 }
 0x22b   : > { %v376_v61 = vrot.slane %v375_v60, 1 }
 0x22d   : > { %v377_v63 = vadd.f32 %v376_v61, %v375_v60 }
 0x22f   : > { %1104 = vpush %v377_v63 }
 0x230   : > { %1106 = vpush %v1237_v62 }
 0x260   : > { %s1570_s7 = spop %1104 }
 0x261   : > { %s1107_s8 = spop %1106  ;;  %p788_p12 = scmp.lt.f32.partialorder %s1570_s7, %s1557_s9 }
 0x262   : > { %s395_s10 = smul.f32 %s1107_s8, %s391_s25  ;;  %v404_v0 = vstv %s1107_s8  ;;  %s448_s8 = ssub.f32 0.0, %s1578_s29 }
 0x263   : > { %v405_v1 = vmul.f32 %v404_v0, %v1542_v2  ;;  %v406_v4 = vmul.f32 %v404_v0, %v1544_v3  ;;  %s444_s25 = smul.f32 0.003921569, %s441_s30  ;;  %s1800_s7 = smov (!%p788_p12, %s1570_s7), %s1557_s9 }
 0x264   : > { %s396_s28 = scvt.f32.s32 %s395_s10  ;;  %s401_s11 = sand.u32 2147483647, %s395_s10 }
 0x265   : > { %s399_s22 = sand.u32 2147483648, %s395_s10  ;;  %p402_p8 = scmp.lt.f32.partialorder %s401_s11, 2.1474836e+09  ;;  %v1108_v5 = vround.rtne.f32 %v405_v1  ;;  %v1109_v6 = vround.rtne.f32 %v406_v4  ;;  %v445_v23 = vstv %s444_s25 }
 0x266   : > { %s397_s12 = scvt.s32.f32 %s396_s28  ;;  %1238 = vrcp.f32 %v445_v23  ;;  %s1802_s5 = smov (!%p788_p12, %s1550_s5), %s1535_s21 }
 0x267   : > { %s1804_s6 = smov (!%p788_p12, %s1552_s6), %s1537_s26 }
 0x268   : > { %s398_s13 = sand.u32 2147483647, %s397_s12 }
 0x269   : > { %s400_s14 = sor.u32 %s399_s22, %s398_s13 }
 0x26a   : > { %s1798_s14 = smov (!%p402_p8, %s400_s14), %s395_s10 }
 0x26b   : > { %v409_v7 = vstv %s1798_s14 }
 0x26c   : > { %v410_v8 = vadd.f32 %v1108_v5, %v409_v7  ;;  %v411_v9 = vadd.f32 %v1109_v6, %v409_v7 }
 0x26e   : > { %v412_v10 = vmax.f32 %v410_v8, 0.0  ;;  %v413_v11 = vmax.f32 %v411_v9, 0.0 }
 0x270   : > { %v414_v12 = vmin.f32 %v412_v10, 255.0  ;;  %v415_v13 = vmin.f32 %v413_v11, 255.0  ;;  %v1239_v30 = vpop.eup %1238 }
 0x272   : > { %v416_v14 = vsub.f32 %v414_v12, %v409_v7  ;;  %v417_v15 = vsub.f32 %v415_v13, %v409_v7 }
 0x274   : > { %v419_v16 = vmul.f32 %v416_v14, %v388_v55  ;;  %v420_v17 = vmul.f32 %v417_v15, %v388_v55 }
 0x276   : > { %v421_v18 = vsub.f32 %v1542_v2, %v419_v16  ;;  %v422_v19 = vsub.f32 %v1544_v3, %v420_v17 }
 0x278   : > { %v424_v20 = vmul.f32 %v421_v18, %v421_v18  ;;  %v425_v21 = vmul.f32 %v422_v19, %v422_v19 }
 0x27a   : > { %v426_v22 = vadd.f32 %v425_v21, %v424_v20 }
 0x27c   : > { %427 = vadd.xlane.f32.xlu1 %v426_v22 }
 0x309   : > { %v428_v24 = vpop.xlane.xlu1 %427 }
 0x30a   : > { %v429_v25 = vrot.slane %v428_v24, 4 }
 0x30c   : > { %v430_v26 = vadd.f32 %v429_v25, %v428_v24 }
 0x30e   : > { %v431_v27 = vrot.slane %v430_v26, 2 }
 0x310   : > { %v432_v28 = vadd.f32 %v431_v27, %v430_v26 }
 0x312   : > { %v433_v29 = vrot.slane %v432_v28, 1 }
 0x314   : > { %v434_v31 = vadd.f32 %v433_v29, %v432_v28 }
 0x316   : > { %1110 = vpush %v434_v31 }
 0x317   : > { %1112 = vpush %v1239_v30 }
 0x347   : > { %s1111_s10 = spop %1110 }
 0x348   : > { %p795_p13 = scmp.lt.f32.partialorder %s1111_s10, %s1800_s7  ;;  %s1113_s28 = spop %1112 }
 0x349   : > { %s452_s11 = smul.f32 %s1113_s28, %s448_s8  ;;  %v461_v32 = vstv %s1113_s28 }
 0x34a   : > { %s1806_s10 = smov (!%p795_p13, %s1111_s10), %s1800_s7  ;;  %s1808_s24 = smov (!%p795_p13, %s1563_s24), %s1802_s5  ;;  %v462_v33 = vmul.f32 %v461_v32, %v1542_v2  ;;  %v463_v34 = vmul.f32 %v461_v32, %v1544_v3 }
 0x34b   : > { %s1810_s27 = smov (!%p795_p13, %s1565_s27), %s1804_s6  ;;  %s453_s12 = scvt.f32.s32 %s452_s11 }
 0x34c   : > { %s458_s22 = sand.u32 2147483647, %s452_s11  ;;  %s456_s14 = sand.u32 2147483648, %s452_s11  ;;  %v1114_v35 = vround.rtne.f32 %v462_v33  ;;  %v1115_v36 = vround.rtne.f32 %v463_v34 }
 0x34d   : > { %s454_s13 = scvt.s32.f32 %s453_s12  ;;  %p459_p0 = scmp.lt.f32.partialorder %s458_s22, 2.1474836e+09 }
 0x34e   : > { %s1603_s5 = sld [smem:[#allocation3 + $0x4]] }
 0x34f   : > { %s455_s21 = sand.u32 2147483647, %s454_s13  ;;  %s1605_s6 = sld [smem:[#allocation9 + $0x4]] }
 0x350   : > { %s457_s26 = sor.u32 %s456_s14, %s455_s21 }
 0x351   : > { %s1812_s26 = smov (!%p459_p0, %s457_s26), %s452_s11 }
 0x352   : > { %v466_v37 = vstv %s1812_s26 }
 0x353   : > { %v467_v38 = vadd.f32 %v1114_v35, %v466_v37  ;;  %v468_v39 = vadd.f32 %v1115_v36, %v466_v37 }
 0x355   : > { %v469_v40 = vmax.f32 %v467_v38, 0.0  ;;  %v470_v41 = vmax.f32 %v468_v39, 0.0  ;;  %s498_s9 = ssub.f32 %s1603_s5, %s1605_s6 }
 0x356   : > { %s505_s30 = ssub.f32 0.0, %s1605_s6 }
 0x357   : > { %v471_v42 = vmin.f32 %v469_v40, 255.0  ;;  %v472_v43 = vmin.f32 %v470_v41, 255.0  ;;  %s501_s7 = smul.f32 0.003921569, %s498_s9 }
 0x359   : > { %v473_v44 = vsub.f32 %v471_v42, %v466_v37  ;;  %v474_v45 = vsub.f32 %v472_v43, %v466_v37  ;;  %v502_v53 = vstv %s501_s7 }
 0x35a   : > { %1240 = vrcp.f32 %v502_v53 }
 0x35b   : > { %v476_v46 = vmul.f32 %v473_v44, %v445_v23  ;;  %v477_v47 = vmul.f32 %v474_v45, %v445_v23 }
 0x35d   : > { %v478_v48 = vsub.f32 %v1542_v2, %v476_v46  ;;  %v479_v49 = vsub.f32 %v1544_v3, %v477_v47 }
 0x35f   : > { %v481_v50 = vmul.f32 %v478_v48, %v478_v48  ;;  %v482_v51 = vmul.f32 %v479_v49, %v479_v49 }
 0x361   : > { %v483_v52 = vadd.f32 %v482_v51, %v481_v50 }
 0x363   : > { %484 = vadd.xlane.f32.xlu1 %v483_v52 }
 0x364   : > { %v1241_v60 = vpop.eup %1240 }
 0x3f0   : > { %v485_v54 = vpop.xlane.xlu1 %484 }
 0x3f1   : > { %v486_v55 = vrot.slane %v485_v54, 4 }
 0x3f3   : > { %v487_v56 = vadd.f32 %v486_v55, %v485_v54 }
 0x3f5   : > { %v488_v57 = vrot.slane %v487_v56, 2 }
 0x3f7   : > { %v489_v58 = vadd.f32 %v488_v57, %v487_v56 }
 0x3f9   : > { %v490_v59 = vrot.slane %v489_v58, 1 }
 0x3fb   : > { %v491_v61 = vadd.f32 %v490_v59, %v489_v58 }
 0x3fd   : > { %1116 = vpush %v491_v61 }
 0x3fe   : > { %1118 = vpush %v1241_v60 }
 0x42e   : > { %s1117_s25 = spop %1116 }
 0x42f   : > { %p802_p1 = scmp.lt.f32.partialorder %s1117_s25, %s1806_s10  ;;  %s1119_s8 = spop %1118 }
 0x430   : > { %s509_s28 = smul.f32 %s1119_s8, %s505_s30  ;;  %v518_v62 = vstv %s1119_s8 }
 0x431   : > { %s1814_s25 = smov (!%p802_p1, %s1117_s25), %s1806_s10  ;;  %s1816_s23 = smov (!%p802_p1, %s1576_s23), %s1808_s24  ;;  %v519_v63 = vmul.f32 %v518_v62, %v1542_v2  ;;  %v520_v0 = vmul.f32 %v518_v62, %v1544_v3 }
 0x432   : > { %s1818_s29 = smov (!%p802_p1, %s1578_s29), %s1810_s27  ;;  %s510_s11 = scvt.f32.s32 %s509_s28 }
 0x433   : > { %s515_s12 = sand.u32 2147483647, %s509_s28  ;;  %s513_s13 = sand.u32 2147483648, %s509_s28  ;;  %v1120_v1 = vround.rtne.f32 %v519_v63  ;;  %v1121_v4 = vround.rtne.f32 %v520_v0 }
 0x434   : > { %s511_s22 = scvt.s32.f32 %s510_s11  ;;  %p516_p2 = scmp.lt.f32.partialorder %s515_s12, 2.1474836e+09 }
 0x435   : > { %s1626_s24 = sld [smem:[#allocation3 + $0x5]] }
 0x436   : > { %s512_s14 = sand.u32 2147483647, %s511_s22  ;;  %s1628_s27 = sld [smem:[#allocation9 + $0x5]] }
 0x437   : > { %s514_s21 = sor.u32 %s513_s13, %s512_s14 }
 0x438   : > { %s1820_s21 = smov (!%p516_p2, %s514_s21), %s509_s28 }
 0x439   : > { %v523_v5 = vstv %s1820_s21 }
 0x43a   : > { %v524_v6 = vadd.f32 %v1120_v1, %v523_v5  ;;  %v525_v7 = vadd.f32 %v1121_v4, %v523_v5 }
 0x43c   : > { %v526_v8 = vmax.f32 %v524_v6, 0.0  ;;  %v527_v9 = vmax.f32 %v525_v7, 0.0  ;;  %s555_s10 = ssub.f32 %s1626_s24, %s1628_s27 }
 0x43d   : > { %s562_s9 = ssub.f32 0.0, %s1628_s27 }
 0x43e   : > { %v528_v10 = vmin.f32 %v526_v8, 255.0  ;;  %v529_v11 = vmin.f32 %v527_v9, 255.0  ;;  %s558_s26 = smul.f32 0.003921569, %s555_s10 }
 0x440   : > { %v530_v12 = vsub.f32 %v528_v10, %v523_v5  ;;  %v531_v13 = vsub.f32 %v529_v11, %v523_v5  ;;  %v559_v21 = vstv %s558_s26 }
 0x441   : > { %1242 = vrcp.f32 %v559_v21 }
 0x442   : > { %v533_v14 = vmul.f32 %v530_v12, %v502_v53  ;;  %v534_v15 = vmul.f32 %v531_v13, %v502_v53 }
 0x444   : > { %v535_v16 = vsub.f32 %v1542_v2, %v533_v14  ;;  %v536_v17 = vsub.f32 %v1544_v3, %v534_v15 }
 0x446   : > { %v538_v18 = vmul.f32 %v535_v16, %v535_v16  ;;  %v539_v19 = vmul.f32 %v536_v17, %v536_v17 }
 0x448   : > { %v540_v20 = vadd.f32 %v539_v19, %v538_v18 }
 0x44a   : > { %541 = vadd.xlane.f32.xlu0 %v540_v20 }
 0x44b   : > { %v1243_v28 = vpop.eup %1242 }
 0x4d7   : > { %v542_v22 = vpop.xlane.xlu0 %541 }
 0x4d8   : > { %v543_v23 = vrot.slane %v542_v22, 4 }
 0x4da   : > { %v544_v24 = vadd.f32 %v543_v23, %v542_v22 }
 0x4dc   : > { %v545_v25 = vrot.slane %v544_v24, 2 }
 0x4de   : > { %v546_v26 = vadd.f32 %v545_v25, %v544_v24 }
 0x4e0   : > { %v547_v27 = vrot.slane %v546_v26, 1 }
 0x4e2   : > { %v548_v29 = vadd.f32 %v547_v27, %v546_v26 }
 0x4e4   : > { %1122 = vpush %v548_v29 }
 0x4e5   : > { %1124 = vpush %v1243_v28 }
 0x515   : > { %s1123_s7 = spop %1122 }
 0x516   : > { %p809_p5 = scmp.lt.f32.partialorder %s1123_s7, %s1814_s25  ;;  %s1125_s30 = spop %1124 }
 0x517   : > { %s566_s8 = smul.f32 %s1125_s30, %s562_s9  ;;  %v575_v30 = vstv %s1125_s30 }
 0x518   : > { %s1822_s7 = smov (!%p809_p5, %s1123_s7), %s1814_s25  ;;  %s1824_s5 = smov (!%p809_p5, %s1603_s5), %s1816_s23  ;;  %v576_v31 = vmul.f32 %v575_v30, %v1542_v2  ;;  %v577_v32 = vmul.f32 %v575_v30, %v1544_v3 }
 0x519   : > { %s1826_s6 = smov (!%p809_p5, %s1605_s6), %s1818_s29  ;;  %s567_s28 = scvt.f32.s32 %s566_s8 }
 0x51a   : > { %s572_s11 = sand.u32 2147483647, %s566_s8  ;;  %s570_s22 = sand.u32 2147483648, %s566_s8  ;;  %v1126_v33 = vround.rtne.f32 %v576_v31  ;;  %v1127_v34 = vround.rtne.f32 %v577_v32 }
 0x51b   : > { %s568_s12 = scvt.s32.f32 %s567_s28  ;;  %p573_p7 = scmp.lt.f32.partialorder %s572_s11, 2.1474836e+09 }
 0x51c   : > { %s1649_s23 = sld [smem:[#allocation3 + $0x6]] }
 0x51d   : > { %s569_s13 = sand.u32 2147483647, %s568_s12  ;;  %s1651_s29 = sld [smem:[#allocation9 + $0x6]] }
 0x51e   : > { %s571_s14 = sor.u32 %s570_s22, %s569_s13 }
 0x51f   : > { %s1828_s14 = smov (!%p573_p7, %s571_s14), %s566_s8 }
 0x520   : > { %v580_v35 = vstv %s1828_s14 }
 0x521   : > { %v581_v36 = vadd.f32 %v1126_v33, %v580_v35  ;;  %v582_v37 = vadd.f32 %v1127_v34, %v580_v35 }
 0x523   : > { %v583_v38 = vmax.f32 %v581_v36, 0.0  ;;  %v584_v39 = vmax.f32 %v582_v37, 0.0  ;;  %s612_s25 = ssub.f32 %s1649_s23, %s1651_s29 }
 0x524   : > { %s619_s10 = ssub.f32 0.0, %s1651_s29 }
 0x525   : > { %v585_v40 = vmin.f32 %v583_v38, 255.0  ;;  %v586_v41 = vmin.f32 %v584_v39, 255.0  ;;  %s615_s21 = smul.f32 0.003921569, %s612_s25 }
 0x527   : > { %v587_v42 = vsub.f32 %v585_v40, %v580_v35  ;;  %v588_v43 = vsub.f32 %v586_v41, %v580_v35  ;;  %v616_v51 = vstv %s615_s21 }
 0x528   : > { %1244 = vrcp.f32 %v616_v51 }
 0x529   : > { %v590_v44 = vmul.f32 %v587_v42, %v559_v21  ;;  %v591_v45 = vmul.f32 %v588_v43, %v559_v21 }
 0x52b   : > { %v592_v46 = vsub.f32 %v1542_v2, %v590_v44  ;;  %v593_v47 = vsub.f32 %v1544_v3, %v591_v45 }
 0x52d   : > { %v595_v48 = vmul.f32 %v592_v46, %v592_v46  ;;  %v596_v49 = vmul.f32 %v593_v47, %v593_v47 }
 0x52f   : > { %v597_v50 = vadd.f32 %v596_v49, %v595_v48 }
 0x531   : > { %598 = vadd.xlane.f32.xlu1 %v597_v50 }
 0x532   : > { %v1245_v58 = vpop.eup %1244 }
 0x5be   : > { %v599_v52 = vpop.xlane.xlu1 %598 }
 0x5bf   : > { %v600_v53 = vrot.slane %v599_v52, 4 }
 0x5c1   : > { %v601_v54 = vadd.f32 %v600_v53, %v599_v52 }
 0x5c3   : > { %v602_v55 = vrot.slane %v601_v54, 2 }
 0x5c5   : > { %v603_v56 = vadd.f32 %v602_v55, %v601_v54 }
 0x5c7   : > { %v604_v57 = vrot.slane %v603_v56, 1 }
 0x5c9   : > { %v605_v59 = vadd.f32 %v604_v57, %v603_v56 }
 0x5cb   : > { %1128 = vpush %v605_v59 }
 0x5cc   : > { %1130 = vpush %v1245_v58 }
 0x5fc   : > { %s1129_s26 = spop %1128 }
 0x5fd   : > { %p816_p9 = scmp.lt.f32.partialorder %s1129_s26, %s1822_s7  ;;  %s1131_s9 = spop %1130 }
 0x5fe   : > { %s623_s30 = smul.f32 %s1131_s9, %s619_s10  ;;  %v632_v60 = vstv %s1131_s9 }
 0x5ff   : > { %s1830_s26 = smov (!%p816_p9, %s1129_s26), %s1822_s7  ;;  %s1832_s24 = smov (!%p816_p9, %s1626_s24), %s1824_s5  ;;  %v633_v61 = vmul.f32 %v632_v60, %v1542_v2  ;;  %v634_v62 = vmul.f32 %v632_v60, %v1544_v3 }
 0x600   : > { %s1834_s27 = smov (!%p816_p9, %s1628_s27), %s1826_s6  ;;  %s624_s8 = scvt.f32.s32 %s623_s30 }
 0x601   : > { %s629_s28 = sand.u32 2147483647, %s623_s30  ;;  %s627_s12 = sand.u32 2147483648, %s623_s30  ;;  %v1132_v63 = vround.rtne.f32 %v633_v61  ;;  %v1133_v0 = vround.rtne.f32 %v634_v62 }
 0x602   : > { %s625_s11 = scvt.s32.f32 %s624_s8  ;;  %p630_p10 = scmp.lt.f32.partialorder %s629_s28, 2.1474836e+09 }
 0x603   : > { %s1672_s5 = sld [smem:[#allocation3 + $0x7]] }
 0x604   : > { %s626_s22 = sand.u32 2147483647, %s625_s11  ;;  %s1674_s6 = sld [smem:[#allocation9 + $0x7]] }
 0x605   : > { %s628_s13 = sor.u32 %s627_s12, %s626_s22 }
 0x606   : > { %s1836_s13 = smov (!%p630_p10, %s628_s13), %s623_s30 }
 0x607   : > { %v637_v1 = vstv %s1836_s13 }
 0x608   : > { %v638_v4 = vadd.f32 %v1132_v63, %v637_v1  ;;  %v639_v5 = vadd.f32 %v1133_v0, %v637_v1 }
 0x60a   : > { %v640_v6 = vmax.f32 %v638_v4, 0.0  ;;  %v641_v7 = vmax.f32 %v639_v5, 0.0  ;;  %s669_s7 = ssub.f32 %s1672_s5, %s1674_s6 }
 0x60b   : > { %s676_s25 = ssub.f32 0.0, %s1674_s6 }
 0x60c   : > { %v642_v8 = vmin.f32 %v640_v6, 255.0  ;;  %v643_v9 = vmin.f32 %v641_v7, 255.0  ;;  %s672_s14 = smul.f32 0.003921569, %s669_s7 }
 0x60e   : > { %v644_v10 = vsub.f32 %v642_v8, %v637_v1  ;;  %v645_v11 = vsub.f32 %v643_v9, %v637_v1  ;;  %v673_v19 = vstv %s672_s14 }
 0x60f   : > { %1246 = vrcp.f32 %v673_v19 }
 0x610   : > { %v647_v12 = vmul.f32 %v644_v10, %v616_v51  ;;  %v648_v13 = vmul.f32 %v645_v11, %v616_v51 }
 0x612   : > { %v649_v14 = vsub.f32 %v1542_v2, %v647_v12  ;;  %v650_v15 = vsub.f32 %v1544_v3, %v648_v13 }
 0x614   : > { %v652_v16 = vmul.f32 %v649_v14, %v649_v14  ;;  %v653_v17 = vmul.f32 %v650_v15, %v650_v15 }
 0x616   : > { %v654_v18 = vadd.f32 %v653_v17, %v652_v16 }
 0x618   : > { %655 = vadd.xlane.f32.xlu0 %v654_v18 }
 0x619   : > { %v1247_v26 = vpop.eup %1246 }
 0x6a5   : > { %v656_v20 = vpop.xlane.xlu0 %655 }
 0x6a6   : > { %v657_v21 = vrot.slane %v656_v20, 4 }
 0x6a8   : > { %v658_v22 = vadd.f32 %v657_v21, %v656_v20 }
 0x6aa   : > { %v659_v23 = vrot.slane %v658_v22, 2 }
 0x6ac   : > { %v660_v24 = vadd.f32 %v659_v23, %v658_v22 }
 0x6ae   : > { %v661_v25 = vrot.slane %v660_v24, 1 }
 0x6b0   : > { %v662_v27 = vadd.f32 %v661_v25, %v660_v24 }
 0x6b2   : > { %1134 = vpush %v662_v27 }
 0x6b3   : > { %1136 = vpush %v1247_v26 }
 0x6e3   : > { %s1135_s21 = spop %1134 }
 0x6e4   : > { %p823_p11 = scmp.lt.f32.partialorder %s1135_s21, %s1830_s26  ;;  %s1137_s10 = spop %1136 }
 0x6e5   : > { %s680_s9 = smul.f32 %s1137_s10, %s676_s25  ;;  %v689_v28 = vstv %s1137_s10 }
 0x6e6   : > { %s1838_s21 = smov (!%p823_p11, %s1135_s21), %s1830_s26  ;;  %s1840_s23 = smov (!%p823_p11, %s1649_s23), %s1832_s24  ;;  %v690_v29 = vmul.f32 %v689_v28, %v1542_v2  ;;  %v691_v30 = vmul.f32 %v689_v28, %v1544_v3 }
 0x6e7   : > { %s1842_s29 = smov (!%p823_p11, %s1651_s29), %s1834_s27  ;;  %s681_s30 = scvt.f32.s32 %s680_s9 }
 0x6e8   : > { %s686_s8 = sand.u32 2147483647, %s680_s9  ;;  %s684_s11 = sand.u32 2147483648, %s680_s9  ;;  %v1138_v31 = vround.rtne.f32 %v690_v29  ;;  %v1139_v32 = vround.rtne.f32 %v691_v30 }
 0x6e9   : > { %s682_s28 = scvt.s32.f32 %s681_s30  ;;  %p687_p3 = scmp.lt.f32.partialorder %s686_s8, 2.1474836e+09 }
 0x6ea   : > { %s1695_s24 = sld [smem:[#allocation3 + $0x8]] }
 0x6eb   : > { %s683_s12 = sand.u32 2147483647, %s682_s28  ;;  %s1697_s27 = sld [smem:[#allocation9 + $0x8]] }
 0x6ec   : > { %s685_s22 = sor.u32 %s684_s11, %s683_s12 }
 0x6ed   : > { %s1844_s22 = smov (!%p687_p3, %s685_s22), %s680_s9 }
 0x6ee   : > { %v694_v33 = vstv %s1844_s22 }
 0x6ef   : > { %v695_v34 = vadd.f32 %v1138_v31, %v694_v33  ;;  %v696_v35 = vadd.f32 %v1139_v32, %v694_v33 }
 0x6f1   : > { %v697_v36 = vmax.f32 %v695_v34, 0.0  ;;  %v698_v37 = vmax.f32 %v696_v35, 0.0  ;;  %s726_s26 = ssub.f32 %s1695_s24, %s1697_s27 }
 0x6f2   : > { %s733_s7 = ssub.f32 0.0, %s1697_s27 }
 0x6f3   : > { %v699_v38 = vmin.f32 %v697_v36, 255.0  ;;  %v700_v39 = vmin.f32 %v698_v37, 255.0  ;;  %s729_s13 = smul.f32 0.003921569, %s726_s26 }
 0x6f5   : > { %v701_v40 = vsub.f32 %v699_v38, %v694_v33  ;;  %v702_v41 = vsub.f32 %v700_v39, %v694_v33  ;;  %v730_v49 = vstv %s729_s13 }
 0x6f6   : > { %1248 = vrcp.f32 %v730_v49 }
 0x6f7   : > { %v704_v42 = vmul.f32 %v701_v40, %v673_v19  ;;  %v705_v43 = vmul.f32 %v702_v41, %v673_v19 }
 0x6f9   : > { %v706_v44 = vsub.f32 %v1542_v2, %v704_v42  ;;  %v707_v45 = vsub.f32 %v1544_v3, %v705_v43 }
 0x6fb   : > { %v709_v46 = vmul.f32 %v706_v44, %v706_v44  ;;  %v710_v47 = vmul.f32 %v707_v45, %v707_v45 }
 0x6fd   : > { %v711_v48 = vadd.f32 %v710_v47, %v709_v46 }
 0x6ff   : > { %712 = vadd.xlane.f32.xlu1 %v711_v48 }
 0x700   : > { %v1249_v56 = vpop.eup %1248 }
 0x78c   : > { %v713_v50 = vpop.xlane.xlu1 %712 }
 0x78d   : > { %v714_v51 = vrot.slane %v713_v50, 4 }
 0x78f   : > { %v715_v52 = vadd.f32 %v714_v51, %v713_v50 }
 0x791   : > { %v716_v53 = vrot.slane %v715_v52, 2 }
 0x793   : > { %v717_v54 = vadd.f32 %v716_v53, %v715_v52 }
 0x795   : > { %v718_v55 = vrot.slane %v717_v54, 1 }
 0x797   : > { %v719_v57 = vadd.f32 %v718_v55, %v717_v54 }
 0x799   : > { %1140 = vpush %v719_v57 }
 0x79a   : > { %1142 = vpush %v1249_v56 }
 0x7ca   : > { %s1141_s14 = spop %1140 }
 0x7cb   : > { %p830_p4 = scmp.lt.f32.partialorder %s1141_s14, %s1838_s21  ;;  %s1143_s25 = spop %1142 }
 0x7cc   : > { %s737_s10 = smul.f32 %s1143_s25, %s733_s7  ;;  %v746_v58 = vstv %s1143_s25 }
 0x7cd   : > { %s1846_s14 = smov (!%p830_p4, %s1141_s14), %s1838_s21  ;;  %s1848_s5 = smov (!%p830_p4, %s1672_s5), %s1840_s23  ;;  %v747_v59 = vmul.f32 %v746_v58, %v1542_v2  ;;  %v748_v60 = vmul.f32 %v746_v58, %v1544_v3 }
 0x7ce   : > { %s1850_s6 = smov (!%p830_p4, %s1674_s6), %s1842_s29  ;;  %s738_s9 = scvt.f32.s32 %s737_s10 }
 0x7cf   : > { %s743_s30 = sand.u32 2147483647, %s737_s10  ;;  %s741_s28 = sand.u32 2147483648, %s737_s10  ;;  %v1144_v61 = vround.rtne.f32 %v747_v59  ;;  %v1145_v62 = vround.rtne.f32 %v748_v60 }
 0x7d0   : > { %s739_s8 = scvt.s32.f32 %s738_s9  ;;  %p744_p6 = scmp.lt.f32.partialorder %s743_s30, 2.1474836e+09 }
 0x7d2   : > { %s740_s11 = sand.u32 2147483647, %s739_s8 }
 0x7d3   : > { %s742_s12 = sor.u32 %s741_s28, %s740_s11 }
 0x7d4   : > { %s1852_s12 = smov (!%p744_p6, %s742_s12), %s737_s10 }
 0x7d5   : > { %v751_v63 = vstv %s1852_s12 }
 0x7d6   : > { %v752_v0 = vadd.f32 %v1144_v61, %v751_v63  ;;  %v753_v1 = vadd.f32 %v1145_v62, %v751_v63 }
 0x7d8   : > { %v754_v4 = vmax.f32 %v752_v0, 0.0  ;;  %v755_v5 = vmax.f32 %v753_v1, 0.0 }
 0x7da   : > { %v756_v6 = vmin.f32 %v754_v4, 255.0  ;;  %v757_v7 = vmin.f32 %v755_v5, 255.0 }
 0x7dc   : > { %v758_v8 = vsub.f32 %v756_v6, %v751_v63  ;;  %v759_v9 = vsub.f32 %v757_v7, %v751_v63 }
 0x7de   : > { %v761_v10 = vmul.f32 %v758_v8, %v730_v49  ;;  %v762_v11 = vmul.f32 %v759_v9, %v730_v49 }
 0x7e0   : > { %v763_v12 = vsub.f32 %v1542_v2, %v761_v10  ;;  %v764_v13 = vsub.f32 %v1544_v3, %v762_v11 }
 0x7e2   : > { %v766_v14 = vmul.f32 %v763_v12, %v763_v12  ;;  %v767_v15 = vmul.f32 %v764_v13, %v764_v13 }
 0x7e4   : > { %v768_v16 = vadd.f32 %v767_v15, %v766_v14 }
 0x7e6   : > { %769 = vadd.xlane.f32.xlu0 %v768_v16 }
 0x873   : > { %v770_v17 = vpop.xlane.xlu0 %769 }
 0x874   : > { %v771_v18 = vrot.slane %v770_v17, 4 }
 0x876   : > { %v772_v19 = vadd.f32 %v771_v18, %v770_v17 }
 0x878   : > { %v773_v20 = vrot.slane %v772_v19, 2 }
 0x87a   : > { %v774_v21 = vadd.f32 %v773_v20, %v772_v19 }
 0x87c   : > { %v775_v22 = vrot.slane %v774_v21, 1 }
 0x87e   : > { %v776_v23 = vadd.f32 %v775_v22, %v774_v21 }
 0x880   : > { %1146 = vpush %v776_v23 }
 0x8b1   : > { %s1147_s23 = spop %1146 }
 0x8b2   : > { %p837_p8 = scmp.lt.f32.partialorder %s1147_s23, %s1846_s14 }
 0x8b4   : > { %s1854_s24 = smov (!%p837_p8, %s1695_s24), %s1848_s5  ;;  %s1856_s27 = smov (!%p837_p8, %s1697_s27), %s1850_s6 }
 0x8b5   : > { %s842_s29 = ssub.f32 %s1854_s24, %s1856_s27 }
 0x8b6   : > { %s846_s22 = ssub.f32 0.0, %s1856_s27 }
 0x8b7   : > { %s845_s21 = smul.f32 0.003921569, %s842_s29 }
 0x8b9   : > { %v847_v2 = vstv %s845_s21  ;;  %860 = sst [smem:[#allocation12]] %s845_s21 }
 0x8ba   : > { %1250 = vrcp.f32 %v847_v2 }
 0x8c4   : > { %v1251_v3 = vpop.eup %1250 }
 0x8c5   : > { %1148 = vpush %v1251_v3 }
 0x8f6   : > { %s1149_s26 = spop %1148 }
 0x8f7   : > { %s850_s13 = smul.f32 %s1149_s26, %s846_s22 }
 0x8f9   : > { %s851_s7 = scvt.f32.s32 %s850_s13  ;;  %s856_s25 = sand.u32 2147483647, %s850_s13 }
 0x8fa   : > { %s854_s9 = sand.u32 2147483648, %s850_s13  ;;  %p857_p12 = scmp.lt.f32.partialorder %s856_s25, 2.1474836e+09 }
 0x8fb   : > { %s852_s10 = scvt.s32.f32 %s851_s7 }
 0x8fd   : > { %s853_s30 = sand.u32 2147483647, %s852_s10 }
 0x8fe   : > { %s855_s8 = sor.u32 %s854_s9, %s853_s30 }
 0x8ff   : > { %s1858_s8 = smov (!%p857_p12, %s855_s8), %s850_s13 }
 0x900   : > { %862 = sst [smem:[#allocation12 + $0x1]] %s1858_s8 }
 0x901 PF: > { %p1086_p13 = scmp.ne.s32.totalorder %s1382_s15, 1 }
 0x902   : > { %s867_s5 = sld [smem:[#allocation12]] (!%p1086_p13)  ;;  %s1087_s6 = sld [smem:[#allocation12 + $0x1]] (!%p1086_p13)  ;;  %v872_v26 = vld [vmem:[#allocation10] sm:$0xff] (!%p1086_p13)  ;;  %v873_v27 = vld [vmem:[#allocation10 + $0x8] sm:$0xff] (!%p1086_p13) }
 0x903   : > { %866 = sbr.rel (%p1086_p13) target bundleno = 2390 (0x956), region = 60 }
 0x908   : > { %v869_v24 = vstv (!%p1086_p13), %s867_s5  ;;  %v879_v31 = vstv (!%p1086_p13), %s1087_s6 }
 0x909   : > { %1252 = vrcp.f32 (!%p1086_p13), %v869_v24 }
 0x913   : > { %v1253_v25 = vpop.eup %1252 }
 0x914   : > { %1150 = vpush %v1253_v25 }
 0x945   : > { %s1151_s24 = spop %1150 }
 0x946   : > { %v874_v28 = vstv %s1151_s24 }
 0x947   : > { %v875_v29 = vmul.f32 %v874_v28, %v872_v26  ;;  %v876_v30 = vmul.f32 %v874_v28, %v873_v27 }
 0x949   : > { %v1152_v32 = vround.rtne.f32 %v875_v29  ;;  %v1153_v33 = vround.rtne.f32 %v876_v30 }
 0x94b   : > { %v880_v34 = vadd.f32 %v1152_v32, %v879_v31  ;;  %v881_v35 = vadd.f32 %v1153_v33, %v879_v31 }
 0x94d   : > { %v882_v36 = vmax.f32 %v880_v34, 0.0  ;;  %v883_v37 = vmax.f32 %v881_v35, 0.0 }
 0x94f   : > { %v884_v38 = vmin.f32 %v882_v36, 255.0  ;;  %v885_v39 = vmin.f32 %v883_v37, 255.0 }
 0x951   : > { %v886_v40 = vsub.f32 %v884_v38, %v879_v31  ;;  %v887_v41 = vsub.f32 %v885_v39, %v879_v31 }
 0x953   : > { %v889_v42 = vmul.f32 %v886_v40, %v869_v24  ;;  %v890_v43 = vmul.f32 %v887_v41, %v869_v24 }
 0x955   : > { %891 = vst [vmem:[#allocation11] sm:$0xff] %v889_v42  ;;  %892 = vst [vmem:[#allocation11 + $0x8] sm:$0xff] %v890_v43 }
 0x956 PF: > { %p1726_p0 = scmp.eq.s32.totalorder %s1027_s18, 1  ;;  %s1397_s27 = smov [#allocation11]  }
 0x957   : > { %s908_s14 = sshll.u32 %s1397_s27, 4  ;;  %s909_s14 = int_to_ptr.vmem [resolvable:$true] %s908_s14 }
 0x958   : > { %s1310_s28 = scalar_lea.vmem %s909_s14, 256  ;;  %s1316_s11 = scalar_lea.vmem %s909_s14, 512 }
 0x959   : > { %p1311_p1 = scmp.ne.s32.totalorder %s909_s14, %s1310_s28  ;;  %p1317_p7 = scmp.lt.s32.totalorder %s909_s14, %s909_s14 }
 0x95a   : > { %p1318_p9 = scmp.lt.s32.totalorder %s1316_s11, %s1310_s28 }
 0x95b   : > { %p1312_p2 = pnand %p1311_p1, %p1726_p0 }
 0x95c   : > { %p1319_p10 = por %p1318_p9, %p1317_p7 }
 0x95d   : > { %p1313_p5 = pneg %p1312_p2 }
 0x95f   : > { %p1320_p11 = pnand %p1319_p10, %p1313_p5 }
 0x961   : > { %1323 = shalt.err (!%p1320_p11)
}
 0x962   : > { %s1324_s23 = scalar_lea.hbm %s1783_s3, 256 }
 0x963   : > { %p1325_p3 = scmp.ne.s32.totalorder %s1783_s3, %s1324_s23  ;;  %p1330_p8 = scmp.lt.u32.totalorder %s1324_s23, %s1783_s3 }
 0x965   : > { %p1326_p4 = pnand %p1325_p3, %p1726_p0 }
 0x967   : > { %p1327_p6 = pneg %p1326_p4 }
 0x969   : > { %p1332_p12 = pnand %p1330_p8, %p1327_p6 }
 0x96b   : > { %1335 = shalt.err (!%p1332_p12)
}
 0x96c   : > { %s1398_s13 = smov 128   ;;  %s1399_s7 = smov 8  }
 0x96d   : > { %1167 = dma.vmem_to_hbm [thread:$0]  (%p1726_p0), %s909_s14, 256, %s1783_s3, [#allocation5], %s1398_s13, %s1398_s13, %s1399_s7  }
 0x96e   : > { %s1336_s8 = scalar_lea.hbm %s1784_s4, 16 }
 0x96f   : > { %p1337_p13 = scmp.ne.s32.totalorder %s1784_s4, %s1336_s8  ;;  %p1342_p5 = scmp.lt.u32.totalorder %s1336_s8, %s1784_s4 }
 0x971   : > { %p1338_p1 = pnand %p1337_p13, %p1726_p0 }
 0x973   : > { %p1339_p2 = pneg %p1338_p1 }
 0x975   : > { %p1344_p7 = pnand %p1342_p5, %p1339_p2 }
 0x977   : > { %1347 = shalt.err (!%p1344_p7)
}
 0x978   : > { %s1400_s28 = smov [#allocation12]  }
 0x979   : > { %1169 = dma.smem_to_hbm (%p1726_p0), %s1400_s28, 16, %s1784_s4, [#allocation7]  }
 0x97a   : > { %1373 = dma.done.wait (%p1726_p0), [#allocation7], 16  }
 0x97b   : > { %1375 = vsyncadd (%p1726_p0), [#allocation7], 4294967280 }
 0x97c   : > { %928 = sfence }
 0x97d PF: > { %p1197_p9 = scmp.ge.s32.totalorder %s1390_s17, 2  ;;  %p1198_p10 = scmp.eq.s32.totalorder %s1028_s19, 1 }
 0x97f   : > { %p1185_p11 = pnand %p1198_p10, %p1197_p9 }
 0x981   : > { %1377 = dma.done.wait (!%p1185_p11), [#allocation5], 256  }
 0x982   : > { %1379 = vsyncadd (!%p1185_p11), [#allocation5], 4294967040  ;;  %s22_s17 = sadd.s32 1, %s1390_s17   ;;  %s1789_s15 = smov %s1386_s16 }
 0x983   : > { %p19_p3 = scmp.ge.s32.totalorder %s22_s17, 4   ;;  %s1790_s16 = smov %s1792_s20 }
 0x985   :  { %21 = sbr.rel (!%p19_p3) target bundleno = 7 (0x7), region = 125 }
 0x98c   :  { %943 = vsyncpa [#allocation4], 1 }
 0x98d   :  { %945 = vsyncpa [#allocation4 + $0x1], 1 }
 0x98e   :  { %946 = vsyncpa [#allocation5], 1 }
 0x98f   :  { %948 = vsyncpa [#allocation5 + $0x1], 1 }
 0x990   :  { %949 = vsyncpa [#allocation6], 1 }
 0x991   :  { %951 = vsyncpa [#allocation6 + $0x1], 1 }
 0x992   :  { %952 = vsyncpa [#allocation7], 1 }
 0x993   :  { %954 = vsyncpa [#allocation7 + $0x1], 1 }
 0x994   :  { %955 = vsyncpa [#allocation8], 1 }
 0x995   :  { %957 = vsyncpa [#allocation8 + $0x1], 1 }

</bundles_post_ra>
